<compile_context>
chip_gen: v5e
topology: v5e:2x2
jax: 0.10.0
libtpu: 0.0.40
codegen_flags: <defaults>
</compile_context>

<pallas_src>
import functools

import jax
import jax.numpy as jnp
from jax import lax
from jax.experimental import pallas as pl
from jax.experimental.pallas import tpu as pltpu

STYLE_DIM = 64
IN_DIM = 64
CP = 128          # lane-dense padded channel width for conv2 outputs / MLP


# ---------------------------------------------------------------------------
# Wrapper-side weight / layout helpers (plain JAX; each ~1x HBM on tiny arrays)
# ---------------------------------------------------------------------------
def _conv_tap_weights(w_oihw, cout_pad):
    """(Cout, Cin, 4, 4) -> (4, 4*Cin, cout_pad) bf16; tap t = 2a+b, K order (p, q, cin).

    Tap (a, b) covers kernel positions (kh, kw) = (2a+p, 2b+q), p,q in {0,1}.
    """
    Cout, Cin, _, _ = w_oihw.shape
    wp = jnp.transpose(w_oihw, (2, 3, 1, 0))                 # (kh, kw, Cin, Cout)
    taps = []
    for a in (0, 1):
        for b in (0, 1):
            taps.append(wp[2 * a:2 * a + 2, 2 * b:2 * b + 2].reshape(4 * Cin, Cout))
    rhs = jnp.stack(taps, axis=0)                            # (4, 4*Cin, Cout)
    if cout_pad > Cout:
        rhs = jnp.pad(rhs, ((0, 0), (0, 0), (0, cout_pad - Cout)))
    return rhs.astype(jnp.bfloat16)


# ---------------------------------------------------------------------------
# Fused kernel: conv1+ReLU -> conv2+ReLU -> masked mean pool -> MLP -> L2 norm
# (one image per grid step; valid_w via SMEM scalar prefetch)
# ---------------------------------------------------------------------------
def _style_encoder_kernel(vw_ref,
                          xq0_ref, xq1_ref,
                          w1a0_ref, w1a1_ref, cb1_ref,
                          w2c_ref, cb2_ref,
                          wl1_ref, bl1_ref, wl2_ref, bl2_ref, wmu_ref, bmu_ref,
                          o_ref,
                          f1_ref, lhs_ref,
                          *, ho1, ho2, wo2):
    ws2 = wo2 + 1

    # ---- phase 0: zero the conv2 s2d slab (its zero halo is load-bearing) --
    f1_ref[...] = jnp.zeros_like(f1_ref)

    w1a0 = w1a0_ref[...]                                     # (8, 32) bf16
    w1a1 = w1a1_ref[...]
    cb1 = cb1_ref[...]                                       # (1, 32) f32

    # ---- phase 1: conv1 + ReLU, written straight into conv2's s2d layout ---
    # conv1 row r0, even conv1 columns come from xq0, odd columns from xq1
    # (both are wrapper-side re-layouts of the padded input; no in-kernel shifts).
    def conv1_rows(r0):
        e = (jnp.dot(xq0_ref[r0], w1a0, preferred_element_type=jnp.float32)
             + jnp.dot(xq0_ref[r0 + 1], w1a1, preferred_element_type=jnp.float32))
        o = (jnp.dot(xq1_ref[r0], w1a0, preferred_element_type=jnp.float32)
             + jnp.dot(xq1_ref[r0 + 1], w1a1, preferred_element_type=jnp.float32))
        e = jnp.maximum(e + cb1, 0.0).astype(f1_ref.dtype)   # (Wo2, 32)
        o = jnp.maximum(o + cb1, 0.0).astype(f1_ref.dtype)
        return e, o

    def p1_body(t, carry):
        # conv1 row 2t   -> f1_pad parity p=1, s2d row t
        e, o = conv1_rows(2 * t)
        f1_ref[t, 0:wo2, 96:128] = e                         # (p=1, q=1)
        f1_ref[t, 1:ws2, 64:96] = o                          # (p=1, q=0)
        # conv1 row 2t+1 -> f1_pad parity p=0, s2d row t+1
        e, o = conv1_rows(2 * t + 1)
        f1_ref[t + 1, 0:wo2, 32:64] = e                      # (p=0, q=1)
        f1_ref[t + 1, 1:ws2, 0:32] = o                       # (p=0, q=0)
        return carry

    lax.fori_loop(0, ho1 // 2, p1_body, 0)

    # ---- phase 2: conv2 + ReLU + length-masked pooling (K-concat taps) -----
    vw = vw_ref[pl.program_id(0)]                            # int32 scalar from SMEM
    col = lax.broadcasted_iota(jnp.int32, (1, wo2), 1)
    mask = (col < vw).astype(jnp.float32)                    # (1, Wo2)
    cb2 = cb2_ref[...]                                       # (1, 128) f32

    def p2_body(r, pooled):
        # Build the K=512 operand for output row r (4 taps juxtaposed along lanes).
        lhs_ref[:, 0:CP] = f1_ref[r, 0:wo2, :]               # tap (a=0, b=0)
        lhs_ref[:, CP:2 * CP] = f1_ref[r, 1:ws2, :]          # tap (a=0, b=1)
        lhs_ref[:, 2 * CP:3 * CP] = f1_ref[r + 1, 0:wo2, :]  # tap (a=1, b=0)
        lhs_ref[:, 3 * CP:4 * CP] = f1_ref[r + 1, 1:ws2, :]  # tap (a=1, b=1)
        y = jnp.dot(lhs_ref[...], w2c_ref[...],
                    preferred_element_type=jnp.float32) + cb2
        y = jnp.maximum(y, 0.0)                              # (Wo2, 128)
        return pooled + jnp.dot(mask, y, preferred_element_type=jnp.float32)

    pooled = lax.fori_loop(0, ho2, p2_body, jnp.zeros((1, CP), jnp.float32))
    pooled = pooled * (1.0 / (float(ho2) * vw.astype(jnp.float32)))

    # ---- phase 3: 3-layer MLP (LeakyReLU 0.01) + L2 normalize ---------------
    h = jnp.dot(pooled, wl1_ref[...], preferred_element_type=jnp.float32) + bl1_ref[...]
    h = jnp.where(h > 0, h, 0.01 * h)
    h = jnp.dot(h, wl2_ref[...], preferred_element_type=jnp.float32) + bl2_ref[...]
    h = jnp.where(h > 0, h, 0.01 * h)
    mu = jnp.dot(h, wmu_ref[...], preferred_element_type=jnp.float32) + bmu_ref[...]
    nrm = jnp.maximum(jnp.sqrt(jnp.sum(mu * mu, axis=1, keepdims=True)), 1e-12)
    o_ref[...] = mu / nrm


def style_encoder_pallas(valid_w, xq0, xq1, w1a0, w1a1, cb1, w2c, cb2, mlp,
                         ho1, ho2, wo2):
    B, hs1, _, _ = xq0.shape
    hs2, ws2 = ho2 + 1, wo2 + 1
    kern = functools.partial(_style_encoder_kernel, ho1=ho1, ho2=ho2, wo2=wo2)
    grid_spec = pltpu.PrefetchScalarGridSpec(
        num_scalar_prefetch=1,                               # valid_w -> SMEM
        grid=(B,),
        in_specs=[
            pl.BlockSpec((None, hs1, wo2, 8), lambda b, vw: (b, 0, 0, 0)),   # xq0
            pl.BlockSpec((None, hs1, wo2, 8), lambda b, vw: (b, 0, 0, 0)),   # xq1
            pl.BlockSpec((8, 32), lambda b, vw: (0, 0)),                     # w1 (a=0)
            pl.BlockSpec((8, 32), lambda b, vw: (0, 0)),                     # w1 (a=1)
            pl.BlockSpec((1, 32), lambda b, vw: (0, 0)),                     # conv1 bias
            pl.BlockSpec((4 * CP, CP), lambda b, vw: (0, 0)),                # conv2 K-concat
            pl.BlockSpec((1, CP), lambda b, vw: (0, 0)),                     # conv2 bias
            pl.BlockSpec((CP, CP), lambda b, vw: (0, 0)),                    # MLP w1
            pl.BlockSpec((1, CP), lambda b, vw: (0, 0)),
            pl.BlockSpec((CP, CP), lambda b, vw: (0, 0)),                    # MLP w2
            pl.BlockSpec((1, CP), lambda b, vw: (0, 0)),
            pl.BlockSpec((CP, CP), lambda b, vw: (0, 0)),                    # mu
            pl.BlockSpec((1, CP), lambda b, vw: (0, 0)),
        ],
        out_specs=pl.BlockSpec((None, 1, CP), lambda b, vw: (b, 0, 0)),
        scratch_shapes=[
            pltpu.VMEM((hs2, ws2, CP), jnp.bfloat16),        # conv1 out in conv2-s2d layout
            pltpu.VMEM((wo2, 4 * CP), jnp.bfloat16),         # per-row K=512 conv2 operand
        ],
    )
    out = pl.pallas_call(
        kern,
        out_shape=jax.ShapeDtypeStruct((B, 1, CP), jnp.float32),
        grid_spec=grid_spec,
        compiler_params=pltpu.CompilerParams(
            dimension_semantics=("parallel",),
            vmem_limit_bytes=32 * 1024 * 1024),              # fits all gens incl. v7x
    )(valid_w, xq0, xq1, w1a0, w1a1, cb1, w2c, cb2, *mlp)
    return out[:, 0, :]


# ---------------------------------------------------------------------------
# Parameters (deterministic synthetic init; shapes match nn.Module __init__)
# ---------------------------------------------------------------------------
def init_params(key):
    ks = jax.random.split(key, 8)

    def w(k, fan_in, shape):
        return jax.random.normal(k, shape, jnp.float32) / jnp.sqrt(float(fan_in))

    return {
        "cw1": w(ks[0], 1 * 16, (32, 1, 4, 4)),       # Conv2d(1, 32, 4, 2, 1)
        "cb1": jnp.zeros((32,), jnp.float32),
        "cw2": w(ks[1], 32 * 16, (64, 32, 4, 4)),     # Conv2d(32, 64, 4, 2, 1)
        "cb2": jnp.zeros((64,), jnp.float32),
        "w1": w(ks[2], IN_DIM, (IN_DIM, IN_DIM)),     # Linear(64, 64)
        "b1": w(ks[3], IN_DIM, (IN_DIM,)),
        "w2": w(ks[4], IN_DIM, (IN_DIM, IN_DIM)),     # Linear(64, 64)
        "b2": w(ks[5], IN_DIM, (IN_DIM,)),
        "wmu": w(ks[6], IN_DIM, (IN_DIM, STYLE_DIM)), # Linear(64, style_dim)
        "bmu": w(ks[7], IN_DIM, (STYLE_DIM,)),
    }


def style_encoder_forward(params, x_nchw, img_lens):
    x = x_nchw[:, 0].astype(jnp.float32)                         # (B, H, W)
    B, H, W = x.shape
    assert H % 4 == 0 and W % 4 == 0, "both stride-2 convs assume H, W divisible by 4"
    ho1, wo1 = H // 2, W // 2
    ho2, wo2 = ho1 // 2, wo1 // 2
    hs1, ws1 = ho1 + 1, wo1 + 1

    # Space-to-depth of the zero-padded input (pure re-layout, ~1x HBM on the raw image):
    # s2d[b, r, w, 2p+q] = xpad[b, 2r+p, 2w+q]
    xp = jnp.pad(x, ((0, 0), (1, 1), (1, 1)))
    s2d = xp.reshape(B, hs1, 2, ws1, 2).transpose(0, 1, 3, 2, 4).reshape(B, hs1, ws1, 4)
    s2d = s2d.astype(jnp.bfloat16)
    # Fold conv1 output-column pairs: even-column view (offset 0) / odd-column view (offset 1).
    xq0 = s2d[:, :, 0:2 * wo2, :].reshape(B, hs1, wo2, 8)
    xq1 = s2d[:, :, 1:1 + 2 * wo2, :].reshape(B, hs1, wo2, 8)

    # conv1 tap weights: K order (b, p, q) to match xq channel order; one per row tap a.
    t1 = _conv_tap_weights(params["cw1"], cout_pad=32)            # (4, 4, 32) bf16
    w1a0 = jnp.concatenate([t1[0], t1[1]], axis=0)                # (8, 32)  a=0, b=0/1
    w1a1 = jnp.concatenate([t1[2], t1[3]], axis=0)                # (8, 32)  a=1, b=0/1
    cb1 = params["cb1"].reshape(1, 32).astype(jnp.float32)

    # conv2 weights K-concatenated over the 4 taps: (512, 128) bf16 (Cout padded 64 -> 128).
    w2c = _conv_tap_weights(params["cw2"], cout_pad=CP).reshape(4 * CP, CP)
    cb2 = jnp.pad(params["cb2"], (0, CP - 64)).reshape(1, CP)

    pad_w = lambda m: jnp.pad(m, ((0, CP - m.shape[0]), (0, CP - m.shape[1])))
    pad_b = lambda v: jnp.pad(v, (0, CP - v.shape[0])).reshape(1, CP)
    mlp = (pad_w(params["w1"]), pad_b(params["b1"]),
           pad_w(params["w2"]), pad_b(params["b2"]),
           pad_w(params["wmu"]), pad_b(params["bmu"]))

    # valid_w = (img_lens // 4).clamp(min=1); slicing feat[..., :valid_w] clips at Wo2.
    valid_w = jnp.clip(img_lens // 4, 1, wo2).astype(jnp.int32)   # (B,)

    out = style_encoder_pallas(valid_w, xq0, xq1, w1a0, w1a1, cb1, w2c, cb2, mlp,
                               ho1, ho2, wo2)                     # (B, 128)
    return out[:, :STYLE_DIM]


# ---------------------------------------------------------------------------
# Pure-JAX reference (f32) for a correctness check
# ---------------------------------------------------------------------------
def _reference_forward(params, x_nchw, img_lens):
    f = lax.conv_general_dilated(x_nchw.astype(jnp.float32), params["cw1"],
                                 window_strides=(2, 2), padding=((1, 1), (1, 1)),
                                 dimension_numbers=("NCHW", "OIHW", "NCHW"))
    f = jnp.maximum(f + params["cb1"][None, :, None, None], 0.0)
    f = lax.conv_general_dilated(f, params["cw2"],
                                 window_strides=(2, 2), padding=((1, 1), (1, 1)),
                                 dimension_numbers=("NCHW", "OIHW", "NCHW"))
    f = jnp.maximum(f + params["cb2"][None, :, None, None], 0.0)   # (B, 64, Ho2, Wo2)
    B, C, Hf, Wf = f.shape
    vw = jnp.clip(img_lens // 4, 1, Wf)
    colmask = jnp.arange(Wf)[None, None, None, :] < vw[:, None, None, None]
    pooled = jnp.sum(jnp.where(colmask, f, 0.0), axis=(2, 3)) / (Hf * vw)[:, None]
    h = pooled @ params["w1"] + params["b1"]
    h = jnp.where(h > 0, h, 0.01 * h)
    h = h @ params["w2"] + params["b2"]
    h = jnp.where(h > 0, h, 0.01 * h)
    mu = h @ params["wmu"] + params["bmu"]
    return mu / jnp.maximum(jnp.linalg.norm(mu, axis=1, keepdims=True), 1e-12)


if __name__ == "__main__":
    key = jax.random.PRNGKey(0)
    pkey, xkey = jax.random.split(key)
    params = init_params(pkey)

    B, H, W = 2, 16, 32
    x = jax.random.normal(xkey, (B, 1, H, W), jnp.float32)
    img_lens = jnp.array([32, 18], dtype=jnp.int32)

    out = style_encoder_forward(params, x, img_lens)
    out = jax.block_until_ready(out)
    assert out.shape == (B, STYLE_DIM)
    assert bool(jnp.all(jnp.isfinite(out)))

    ref = _reference_forward(params, x, img_lens)
    err = float(jnp.max(jnp.abs(out - ref)))
    assert err < 3e-2, f"max abs err vs f32 reference: {err}"
    nrm = jnp.linalg.norm(out, axis=1)
    assert bool(jnp.all(jnp.abs(nrm - 1.0) < 1e-2))
    print("KERNEL_OK")
</pallas_src>

<mosaic_0001>
module attributes {stable_mosaic.version = 11 : i64} {
  func.func @_style_encoder_kernel(%arg0: i32, %arg1: memref<2xi32, #tpu.memory_space<smem>>, %arg2: memref<1x9x8x8xbf16, #tpu.memory_space<vmem>>, %arg3: memref<1x9x8x8xbf16, #tpu.memory_space<vmem>>, %arg4: memref<8x32xbf16, #tpu.memory_space<vmem>>, %arg5: memref<8x32xbf16, #tpu.memory_space<vmem>>, %arg6: memref<1x32xf32, #tpu.memory_space<vmem>>, %arg7: memref<512x128xbf16, #tpu.memory_space<vmem>>, %arg8: memref<1x128xf32, #tpu.memory_space<vmem>>, %arg9: memref<128x128xf32, #tpu.memory_space<vmem>>, %arg10: memref<1x128xf32, #tpu.memory_space<vmem>>, %arg11: memref<128x128xf32, #tpu.memory_space<vmem>>, %arg12: memref<1x128xf32, #tpu.memory_space<vmem>>, %arg13: memref<128x128xf32, #tpu.memory_space<vmem>>, %arg14: memref<1x128xf32, #tpu.memory_space<vmem>>, %arg15: memref<1x1x128xf32, #tpu.memory_space<vmem>>, %arg16: memref<5x9x128xbf16, #tpu.memory_space<vmem>>, %arg17: memref<8x512xbf16, #tpu.memory_space<vmem>>) attributes {dimension_semantics = [#tpu.dimension_semantics<parallel>], iteration_bounds = array<i64: 2>, scalar_prefetch = 1 : i64, scratch_operands = 2 : i64, tpu.core_type = #tpu.core_type<tc>, window_params = [{transform_indices = @transform_0, window_bounds = array<i64: 1, 9, 8, 8>}, {transform_indices = @transform_1, window_bounds = array<i64: 1, 9, 8, 8>}, {pipeline_mode = #tpu.pipeline_mode<synchronous>, transform_indices = @transform_2, window_bounds = array<i64: 8, 32>}, {pipeline_mode = #tpu.pipeline_mode<synchronous>, transform_indices = @transform_3, window_bounds = array<i64: 8, 32>}, {pipeline_mode = #tpu.pipeline_mode<synchronous>, transform_indices = @transform_4, window_bounds = array<i64: 1, 32>}, {pipeline_mode = #tpu.pipeline_mode<synchronous>, transform_indices = @transform_5, window_bounds = array<i64: 512, 128>}, {pipeline_mode = #tpu.pipeline_mode<synchronous>, transform_indices = @transform_6, window_bounds = array<i64: 1, 128>}, {pipeline_mode = #tpu.pipeline_mode<synchronous>, transform_indices = @transform_7, window_bounds = array<i64: 128, 128>}, {pipeline_mode = #tpu.pipeline_mode<synchronous>, transform_indices = @transform_8, window_bounds = array<i64: 1, 128>}, {pipeline_mode = #tpu.pipeline_mode<synchronous>, transform_indices = @transform_9, window_bounds = array<i64: 128, 128>}, {pipeline_mode = #tpu.pipeline_mode<synchronous>, transform_indices = @transform_10, window_bounds = array<i64: 1, 128>}, {pipeline_mode = #tpu.pipeline_mode<synchronous>, transform_indices = @transform_11, window_bounds = array<i64: 128, 128>}, {pipeline_mode = #tpu.pipeline_mode<synchronous>, transform_indices = @transform_12, window_bounds = array<i64: 1, 128>}, {transform_indices = @transform_13, window_bounds = array<i64: 1, 1, 128>}]} {
    %cst = arith.constant 0.000000e+00 : bf16
    %0 = vector.broadcast %cst : bf16 to vector<5x9x128xbf16>
    %c0 = arith.constant 0 : index
    %c0_0 = arith.constant 0 : index
    %c0_1 = arith.constant 0 : index
    %1 = vector.load %arg16[%c0, %c0_0, %c0_1] : memref<5x9x128xbf16, #tpu.memory_space<vmem>>, vector<5x9x128xbf16>
    tpu.vector_store %arg16[%c0, %c0_0, %c0_1], %0 {strides = array<i32>} : memref<5x9x128xbf16, #tpu.memory_space<vmem>>, vector<5x9x128xbf16>,
    %c0_2 = arith.constant 0 : index
    %c0_3 = arith.constant 0 : index
    %2 = vector.load %arg4[%c0_2, %c0_3] : memref<8x32xbf16, #tpu.memory_space<vmem>>, vector<8x32xbf16>
    %c0_4 = arith.constant 0 : index
    %c0_5 = arith.constant 0 : index
    %3 = vector.load %arg5[%c0_4, %c0_5] : memref<8x32xbf16, #tpu.memory_space<vmem>>, vector<8x32xbf16>
    %c0_6 = arith.constant 0 : index
    %c0_7 = arith.constant 0 : index
    %4 = vector.load %arg6[%c0_6, %c0_7] : memref<1x32xf32, #tpu.memory_space<vmem>>, vector<1x32xf32>
    %c0_i32 = arith.constant 0 : i32
    %c4_i32 = arith.constant 4 : i32
    %5 = arith.addi %c0_i32, %c4_i32 : i32
    %c1_i32 = arith.constant 1 : i32
    scf.for %arg18 = %c0_i32 to %5 step %c1_i32  : i32 {
      %c2_i32 = arith.constant 2 : i32
      %55 = arith.muli %c2_i32, %arg18 : i32
      %c0_42 = arith.constant 0 : index
      %56 = arith.index_cast %55 : i32 to index
      %c0_43 = arith.constant 0 : index
      %c0_44 = arith.constant 0 : index
      %57 = vector.load %arg2[%c0_42, %56, %c0_43, %c0_44] : memref<1x9x8x8xbf16, #tpu.memory_space<vmem>>, vector<1x1x8x8xbf16>
      %58 = vector.shape_cast %57 : vector<1x1x8x8xbf16> to vector<8x8xbf16>
      %cst_45 = arith.constant dense<0.000000e+00> : vector<8x32xf32>
      %59 = tpu.matmul %58, %2, %cst_45 {dimension_numbers = #tpu.dot_dimension_numbers<[1], [0], [0], [1], [0, 0, 1, 1], [], []>} : vector<8x8xbf16>, vector<8x32xbf16>, vector<8x32xf32> -> vector<8x32xf32>
      %c1_i32_46 = arith.constant 1 : i32
      %60 = arith.addi %55, %c1_i32_46 : i32
      %c0_47 = arith.constant 0 : index
      %61 = arith.index_cast %60 : i32 to index
      %c0_48 = arith.constant 0 : index
      %c0_49 = arith.constant 0 : index
      %62 = vector.load %arg2[%c0_47, %61, %c0_48, %c0_49] : memref<1x9x8x8xbf16, #tpu.memory_space<vmem>>, vector<1x1x8x8xbf16>
      %63 = vector.shape_cast %62 : vector<1x1x8x8xbf16> to vector<8x8xbf16>
      %cst_50 = arith.constant dense<0.000000e+00> : vector<8x32xf32>
      %64 = tpu.matmul %63, %3, %cst_50 {dimension_numbers = #tpu.dot_dimension_numbers<[1], [0], [0], [1], [0, 0, 1, 1], [], []>} : vector<8x8xbf16>, vector<8x32xbf16>, vector<8x32xf32> -> vector<8x32xf32>
      %65 = arith.addf %59, %64 : vector<8x32xf32>
      %c0_51 = arith.constant 0 : index
      %66 = arith.index_cast %55 : i32 to index
      %c0_52 = arith.constant 0 : index
      %c0_53 = arith.constant 0 : index
      %67 = vector.load %arg3[%c0_51, %66, %c0_52, %c0_53] : memref<1x9x8x8xbf16, #tpu.memory_space<vmem>>, vector<1x1x8x8xbf16>
      %68 = vector.shape_cast %67 : vector<1x1x8x8xbf16> to vector<8x8xbf16>
      %cst_54 = arith.constant dense<0.000000e+00> : vector<8x32xf32>
      %69 = tpu.matmul %68, %2, %cst_54 {dimension_numbers = #tpu.dot_dimension_numbers<[1], [0], [0], [1], [0, 0, 1, 1], [], []>} : vector<8x8xbf16>, vector<8x32xbf16>, vector<8x32xf32> -> vector<8x32xf32>
      %c1_i32_55 = arith.constant 1 : i32
      %70 = arith.addi %55, %c1_i32_55 : i32
      %c0_56 = arith.constant 0 : index
      %71 = arith.index_cast %70 : i32 to index
      %c0_57 = arith.constant 0 : index
      %c0_58 = arith.constant 0 : index
      %72 = vector.load %arg3[%c0_56, %71, %c0_57, %c0_58] : memref<1x9x8x8xbf16, #tpu.memory_space<vmem>>, vector<1x1x8x8xbf16>
      %73 = vector.shape_cast %72 : vector<1x1x8x8xbf16> to vector<8x8xbf16>
      %cst_59 = arith.constant dense<0.000000e+00> : vector<8x32xf32>
      %74 = tpu.matmul %73, %3, %cst_59 {dimension_numbers = #tpu.dot_dimension_numbers<[1], [0], [0], [1], [0, 0, 1, 1], [], []>} : vector<8x8xbf16>, vector<8x32xbf16>, vector<8x32xf32> -> vector<8x32xf32>
      %75 = arith.addf %69, %74 : vector<8x32xf32>
      %76 = vector.broadcast %4 : vector<1x32xf32> to vector<8x32xf32>
      %77 = arith.addf %65, %76 : vector<8x32xf32>
      %cst_60 = arith.constant 0.000000e+00 : f32
      %78 = vector.broadcast %cst_60 : f32 to vector<8x32xf32>
      %79 = arith.maximumf %77, %78 : vector<8x32xf32>
      %80 = arith.truncf %79 : vector<8x32xf32> to vector<8x32xbf16>
      %81 = vector.broadcast %4 : vector<1x32xf32> to vector<8x32xf32>
      %82 = arith.addf %75, %81 : vector<8x32xf32>
      %cst_61 = arith.constant 0.000000e+00 : f32
      %83 = vector.broadcast %cst_61 : f32 to vector<8x32xf32>
      %84 = arith.maximumf %82, %83 : vector<8x32xf32>
      %85 = arith.truncf %84 : vector<8x32xf32> to vector<8x32xbf16>
      %86 = arith.index_cast %arg18 : i32 to index
      %c0_62 = arith.constant 0 : index
      %c96 = arith.constant 96 : index
      %87 = vector.load %arg16[%86, %c0_62, %c96] : memref<5x9x128xbf16, #tpu.memory_space<vmem>>, vector<1x8x32xbf16>
      %88 = vector.shape_cast %87 : vector<1x8x32xbf16> to vector<8x32xbf16>
      %89 = vector.shape_cast %80 : vector<8x32xbf16> to vector<1x8x32xbf16>
      tpu.vector_store %arg16[%86, %c0_62, %c96], %89 {strides = array<i32>} : memref<5x9x128xbf16, #tpu.memory_space<vmem>>, vector<1x8x32xbf16>,
      %90 = arith.index_cast %arg18 : i32 to index
      %c1 = arith.constant 1 : index
      %c64 = arith.constant 64 : index
      %91 = vector.load %arg16[%90, %c1, %c64] : memref<5x9x128xbf16, #tpu.memory_space<vmem>>, vector<1x8x32xbf16>
      %92 = vector.shape_cast %91 : vector<1x8x32xbf16> to vector<8x32xbf16>
      %93 = vector.shape_cast %85 : vector<8x32xbf16> to vector<1x8x32xbf16>
      tpu.vector_store %arg16[%90, %c1, %c64], %93 {strides = array<i32>} : memref<5x9x128xbf16, #tpu.memory_space<vmem>>, vector<1x8x32xbf16>,
      %c2_i32_63 = arith.constant 2 : i32
      %94 = arith.muli %c2_i32_63, %arg18 : i32
      %c1_i32_64 = arith.constant 1 : i32
      %95 = arith.addi %94, %c1_i32_64 : i32
      %c0_65 = arith.constant 0 : index
      %96 = arith.index_cast %95 : i32 to index
      %c0_66 = arith.constant 0 : index
      %c0_67 = arith.constant 0 : index
      %97 = vector.load %arg2[%c0_65, %96, %c0_66, %c0_67] : memref<1x9x8x8xbf16, #tpu.memory_space<vmem>>, vector<1x1x8x8xbf16>
      %98 = vector.shape_cast %97 : vector<1x1x8x8xbf16> to vector<8x8xbf16>
      %cst_68 = arith.constant dense<0.000000e+00> : vector<8x32xf32>
      %99 = tpu.matmul %98, %2, %cst_68 {dimension_numbers = #tpu.dot_dimension_numbers<[1], [0], [0], [1], [0, 0, 1, 1], [], []>} : vector<8x8xbf16>, vector<8x32xbf16>, vector<8x32xf32> -> vector<8x32xf32>
      %c1_i32_69 = arith.constant 1 : i32
      %100 = arith.addi %95, %c1_i32_69 : i32
      %c0_70 = arith.constant 0 : index
      %101 = arith.index_cast %100 : i32 to index
      %c0_71 = arith.constant 0 : index
      %c0_72 = arith.constant 0 : index
      %102 = vector.load %arg2[%c0_70, %101, %c0_71, %c0_72] : memref<1x9x8x8xbf16, #tpu.memory_space<vmem>>, vector<1x1x8x8xbf16>
      %103 = vector.shape_cast %102 : vector<1x1x8x8xbf16> to vector<8x8xbf16>
      %cst_73 = arith.constant dense<0.000000e+00> : vector<8x32xf32>
      %104 = tpu.matmul %103, %3, %cst_73 {dimension_numbers = #tpu.dot_dimension_numbers<[1], [0], [0], [1], [0, 0, 1, 1], [], []>} : vector<8x8xbf16>, vector<8x32xbf16>, vector<8x32xf32> -> vector<8x32xf32>
      %105 = arith.addf %99, %104 : vector<8x32xf32>
      %c0_74 = arith.constant 0 : index
      %106 = arith.index_cast %95 : i32 to index
      %c0_75 = arith.constant 0 : index
      %c0_76 = arith.constant 0 : index
      %107 = vector.load %arg3[%c0_74, %106, %c0_75, %c0_76] : memref<1x9x8x8xbf16, #tpu.memory_space<vmem>>, vector<1x1x8x8xbf16>
      %108 = vector.shape_cast %107 : vector<1x1x8x8xbf16> to vector<8x8xbf16>
      %cst_77 = arith.constant dense<0.000000e+00> : vector<8x32xf32>
      %109 = tpu.matmul %108, %2, %cst_77 {dimension_numbers = #tpu.dot_dimension_numbers<[1], [0], [0], [1], [0, 0, 1, 1], [], []>} : vector<8x8xbf16>, vector<8x32xbf16>, vector<8x32xf32> -> vector<8x32xf32>
      %c1_i32_78 = arith.constant 1 : i32
      %110 = arith.addi %95, %c1_i32_78 : i32
      %c0_79 = arith.constant 0 : index
      %111 = arith.index_cast %110 : i32 to index
      %c0_80 = arith.constant 0 : index
      %c0_81 = arith.constant 0 : index
      %112 = vector.load %arg3[%c0_79, %111, %c0_80, %c0_81] : memref<1x9x8x8xbf16, #tpu.memory_space<vmem>>, vector<1x1x8x8xbf16>
      %113 = vector.shape_cast %112 : vector<1x1x8x8xbf16> to vector<8x8xbf16>
      %cst_82 = arith.constant dense<0.000000e+00> : vector<8x32xf32>
      %114 = tpu.matmul %113, %3, %cst_82 {dimension_numbers = #tpu.dot_dimension_numbers<[1], [0], [0], [1], [0, 0, 1, 1], [], []>} : vector<8x8xbf16>, vector<8x32xbf16>, vector<8x32xf32> -> vector<8x32xf32>
      %115 = arith.addf %109, %114 : vector<8x32xf32>
      %116 = vector.broadcast %4 : vector<1x32xf32> to vector<8x32xf32>
      %117 = arith.addf %105, %116 : vector<8x32xf32>
      %cst_83 = arith.constant 0.000000e+00 : f32
      %118 = vector.broadcast %cst_83 : f32 to vector<8x32xf32>
      %119 = arith.maximumf %117, %118 : vector<8x32xf32>
      %120 = arith.truncf %119 : vector<8x32xf32> to vector<8x32xbf16>
      %121 = vector.broadcast %4 : vector<1x32xf32> to vector<8x32xf32>
      %122 = arith.addf %115, %121 : vector<8x32xf32>
      %cst_84 = arith.constant 0.000000e+00 : f32
      %123 = vector.broadcast %cst_84 : f32 to vector<8x32xf32>
      %124 = arith.maximumf %122, %123 : vector<8x32xf32>
      %125 = arith.truncf %124 : vector<8x32xf32> to vector<8x32xbf16>
      %c1_i32_85 = arith.constant 1 : i32
      %126 = arith.addi %arg18, %c1_i32_85 : i32
      %127 = arith.index_cast %126 : i32 to index
      %c0_86 = arith.constant 0 : index
      %c32 = arith.constant 32 : index
      %128 = vector.load %arg16[%127, %c0_86, %c32] : memref<5x9x128xbf16, #tpu.memory_space<vmem>>, vector<1x8x32xbf16>
      %129 = vector.shape_cast %128 : vector<1x8x32xbf16> to vector<8x32xbf16>
      %130 = vector.shape_cast %120 : vector<8x32xbf16> to vector<1x8x32xbf16>
      tpu.vector_store %arg16[%127, %c0_86, %c32], %130 {strides = array<i32>} : memref<5x9x128xbf16, #tpu.memory_space<vmem>>, vector<1x8x32xbf16>,
      %c1_i32_87 = arith.constant 1 : i32
      %131 = arith.addi %arg18, %c1_i32_87 : i32
      %132 = arith.index_cast %131 : i32 to index
      %c1_88 = arith.constant 1 : index
      %c0_89 = arith.constant 0 : index
      %133 = vector.load %arg16[%132, %c1_88, %c0_89] : memref<5x9x128xbf16, #tpu.memory_space<vmem>>, vector<1x8x32xbf16>
      %134 = vector.shape_cast %133 : vector<1x8x32xbf16> to vector<8x32xbf16>
      %135 = vector.shape_cast %125 : vector<8x32xbf16> to vector<1x8x32xbf16>
      tpu.vector_store %arg16[%132, %c1_88, %c0_89], %135 {strides = array<i32>} : memref<5x9x128xbf16, #tpu.memory_space<vmem>>, vector<1x8x32xbf16>,
    }
    %c4_i32_8 = arith.constant 4 : i32
    %6 = arith.index_cast %arg0 : i32 to index
    %7 = memref.load %arg1[%6] : memref<2xi32, #tpu.memory_space<smem>>
    %8 = tpu.iota {dimensions = array<i32: 1>} : vector<1x8xi32>
    %9 = vector.broadcast %7 : i32 to vector<1x8xi32>
    %10 = arith.cmpi slt, %8, %9 : vector<1x8xi32>
    %11 = arith.extui %10 : vector<1x8xi1> to vector<1x8xi32>
    %12 = arith.sitofp %11 : vector<1x8xi32> to vector<1x8xf32>
    %c0_9 = arith.constant 0 : index
    %c0_10 = arith.constant 0 : index
    %13 = vector.load %arg8[%c0_9, %c0_10] : memref<1x128xf32, #tpu.memory_space<vmem>>, vector<1x128xf32>
    %cst_11 = arith.constant 0.000000e+00 : f32
    %14 = vector.broadcast %cst_11 : f32 to vector<1x128xf32>
    %c0_i32_12 = arith.constant 0 : i32
    %c4_i32_13 = arith.constant 4 : i32
    %15 = arith.addi %c0_i32_12, %c4_i32_13 : i32
    %c1_i32_14 = arith.constant 1 : i32
    %16 = scf.for %arg18 = %c0_i32_12 to %15 step %c1_i32_14 iter_args(%arg19 = %14) -> (vector<1x128xf32>)  : i32 {
      %55 = arith.index_cast %arg18 : i32 to index
      %c0_42 = arith.constant 0 : index
      %c0_43 = arith.constant 0 : index
      %56 = vector.load %arg16[%55, %c0_42, %c0_43] : memref<5x9x128xbf16, #tpu.memory_space<vmem>>, vector<1x8x128xbf16>
      %57 = vector.shape_cast %56 : vector<1x8x128xbf16> to vector<8x128xbf16>
      %c0_44 = arith.constant 0 : index
      %c0_45 = arith.constant 0 : index
      %58 = vector.load %arg17[%c0_44, %c0_45] : memref<8x512xbf16, #tpu.memory_space<vmem>>, vector<8x128xbf16>
      tpu.vector_store %arg17[%c0_44, %c0_45], %57 {strides = array<i32>} : memref<8x512xbf16, #tpu.memory_space<vmem>>, vector<8x128xbf16>,
      %59 = arith.index_cast %arg18 : i32 to index
      %c1 = arith.constant 1 : index
      %c0_46 = arith.constant 0 : index
      %60 = vector.load %arg16[%59, %c1, %c0_46] : memref<5x9x128xbf16, #tpu.memory_space<vmem>>, vector<1x8x128xbf16>
      %61 = vector.shape_cast %60 : vector<1x8x128xbf16> to vector<8x128xbf16>
      %c0_47 = arith.constant 0 : index
      %c128 = arith.constant 128 : index
      %62 = vector.load %arg17[%c0_47, %c128] : memref<8x512xbf16, #tpu.memory_space<vmem>>, vector<8x128xbf16>
      tpu.vector_store %arg17[%c0_47, %c128], %61 {strides = array<i32>} : memref<8x512xbf16, #tpu.memory_space<vmem>>, vector<8x128xbf16>,
      %c1_i32_48 = arith.constant 1 : i32
      %63 = arith.addi %arg18, %c1_i32_48 : i32
      %64 = arith.index_cast %63 : i32 to index
      %c0_49 = arith.constant 0 : index
      %c0_50 = arith.constant 0 : index
      %65 = vector.load %arg16[%64, %c0_49, %c0_50] : memref<5x9x128xbf16, #tpu.memory_space<vmem>>, vector<1x8x128xbf16>
      %66 = vector.shape_cast %65 : vector<1x8x128xbf16> to vector<8x128xbf16>
      %c0_51 = arith.constant 0 : index
      %c256 = arith.constant 256 : index
      %67 = vector.load %arg17[%c0_51, %c256] : memref<8x512xbf16, #tpu.memory_space<vmem>>, vector<8x128xbf16>
      tpu.vector_store %arg17[%c0_51, %c256], %66 {strides = array<i32>} : memref<8x512xbf16, #tpu.memory_space<vmem>>, vector<8x128xbf16>,
      %c1_i32_52 = arith.constant 1 : i32
      %68 = arith.addi %arg18, %c1_i32_52 : i32
      %69 = arith.index_cast %68 : i32 to index
      %c1_53 = arith.constant 1 : index
      %c0_54 = arith.constant 0 : index
      %70 = vector.load %arg16[%69, %c1_53, %c0_54] : memref<5x9x128xbf16, #tpu.memory_space<vmem>>, vector<1x8x128xbf16>
      %71 = vector.shape_cast %70 : vector<1x8x128xbf16> to vector<8x128xbf16>
      %c0_55 = arith.constant 0 : index
      %c384 = arith.constant 384 : index
      %72 = vector.load %arg17[%c0_55, %c384] : memref<8x512xbf16, #tpu.memory_space<vmem>>, vector<8x128xbf16>
      tpu.vector_store %arg17[%c0_55, %c384], %71 {strides = array<i32>} : memref<8x512xbf16, #tpu.memory_space<vmem>>, vector<8x128xbf16>,
      %c0_56 = arith.constant 0 : index
      %c0_57 = arith.constant 0 : index
      %73 = vector.load %arg17[%c0_56, %c0_57] : memref<8x512xbf16, #tpu.memory_space<vmem>>, vector<8x512xbf16>
      %c0_58 = arith.constant 0 : index
      %c0_59 = arith.constant 0 : index
      %74 = vector.load %arg7[%c0_58, %c0_59] : memref<512x128xbf16, #tpu.memory_space<vmem>>, vector<512x128xbf16>
      %cst_60 = arith.constant dense<0.000000e+00> : vector<8x128xf32>
      %75 = tpu.matmul %73, %74, %cst_60 {dimension_numbers = #tpu.dot_dimension_numbers<[1], [0], [0], [1], [0, 0, 1, 1], [], []>} : vector<8x512xbf16>, vector<512x128xbf16>, vector<8x128xf32> -> vector<8x128xf32>
      %76 = vector.broadcast %13 : vector<1x128xf32> to vector<8x128xf32>
      %77 = arith.addf %75, %76 : vector<8x128xf32>
      %cst_61 = arith.constant 0.000000e+00 : f32
      %78 = vector.broadcast %cst_61 : f32 to vector<8x128xf32>
      %79 = arith.maximumf %77, %78 : vector<8x128xf32>
      %cst_62 = arith.constant dense<0.000000e+00> : vector<1x128xf32>
      %80 = tpu.matmul %12, %79, %cst_62 {dimension_numbers = #tpu.dot_dimension_numbers<[1], [0], [0], [1], [0, 0, 1, 1], [], []>} : vector<1x8xf32>, vector<8x128xf32>, vector<1x128xf32> -> vector<1x128xf32>
      %81 = arith.addf %arg19, %80 : vector<1x128xf32>
      scf.yield %81 : vector<1x128xf32>
    }
    %c4_i32_15 = arith.constant 4 : i32
    %17 = arith.sitofp %7 : i32 to f32
    %cst_16 = arith.constant 4.000000e+00 : f32
    %18 = arith.mulf %cst_16, %17 : f32
    %cst_17 = arith.constant 1.000000e+00 : f32
    %19 = arith.divf %cst_17, %18 : f32
    %20 = vector.broadcast %19 : f32 to vector<1x128xf32>
    %21 = arith.mulf %16, %20 : vector<1x128xf32>
    %c0_18 = arith.constant 0 : index
    %c0_19 = arith.constant 0 : index
    %22 = vector.load %arg9[%c0_18, %c0_19] : memref<128x128xf32, #tpu.memory_space<vmem>>, vector<128x128xf32>
    %cst_20 = arith.constant dense<0.000000e+00> : vector<1x128xf32>
    %23 = tpu.matmul %21, %22, %cst_20 {dimension_numbers = #tpu.dot_dimension_numbers<[1], [0], [0], [1], [0, 0, 1, 1], [], []>} : vector<1x128xf32>, vector<128x128xf32>, vector<1x128xf32> -> vector<1x128xf32>
    %c0_21 = arith.constant 0 : index
    %c0_22 = arith.constant 0 : index
    %24 = vector.load %arg10[%c0_21, %c0_22] : memref<1x128xf32, #tpu.memory_space<vmem>>, vector<1x128xf32>
    %25 = arith.addf %23, %24 : vector<1x128xf32>
    %cst_23 = arith.constant 0.000000e+00 : f32
    %26 = vector.broadcast %cst_23 : f32 to vector<1x128xf32>
    %27 = arith.cmpf ogt, %25, %26 : vector<1x128xf32>
    %cst_24 = arith.constant 0.00999999977 : f32
    %28 = vector.broadcast %cst_24 : f32 to vector<1x128xf32>
    %29 = arith.mulf %28, %25 : vector<1x128xf32>
    %30 = arith.select %27, %25, %29 : vector<1x128xi1>, vector<1x128xf32>
    %c0_25 = arith.constant 0 : index
    %c0_26 = arith.constant 0 : index
    %31 = vector.load %arg11[%c0_25, %c0_26] : memref<128x128xf32, #tpu.memory_space<vmem>>, vector<128x128xf32>
    %cst_27 = arith.constant dense<0.000000e+00> : vector<1x128xf32>
    %32 = tpu.matmul %30, %31, %cst_27 {dimension_numbers = #tpu.dot_dimension_numbers<[1], [0], [0], [1], [0, 0, 1, 1], [], []>} : vector<1x128xf32>, vector<128x128xf32>, vector<1x128xf32> -> vector<1x128xf32>
    %c0_28 = arith.constant 0 : index
    %c0_29 = arith.constant 0 : index
    %33 = vector.load %arg12[%c0_28, %c0_29] : memref<1x128xf32, #tpu.memory_space<vmem>>, vector<1x128xf32>
    %34 = arith.addf %32, %33 : vector<1x128xf32>
    %cst_30 = arith.constant 0.000000e+00 : f32
    %35 = vector.broadcast %cst_30 : f32 to vector<1x128xf32>
    %36 = arith.cmpf ogt, %34, %35 : vector<1x128xf32>
    %cst_31 = arith.constant 0.00999999977 : f32
    %37 = vector.broadcast %cst_31 : f32 to vector<1x128xf32>
    %38 = arith.mulf %37, %34 : vector<1x128xf32>
    %39 = arith.select %36, %34, %38 : vector<1x128xi1>, vector<1x128xf32>
    %c0_32 = arith.constant 0 : index
    %c0_33 = arith.constant 0 : index
    %40 = vector.load %arg13[%c0_32, %c0_33] : memref<128x128xf32, #tpu.memory_space<vmem>>, vector<128x128xf32>
    %cst_34 = arith.constant dense<0.000000e+00> : vector<1x128xf32>
    %41 = tpu.matmul %39, %40, %cst_34 {dimension_numbers = #tpu.dot_dimension_numbers<[1], [0], [0], [1], [0, 0, 1, 1], [], []>} : vector<1x128xf32>, vector<128x128xf32>, vector<1x128xf32> -> vector<1x128xf32>
    %c0_35 = arith.constant 0 : index
    %c0_36 = arith.constant 0 : index
    %42 = vector.load %arg14[%c0_35, %c0_36] : memref<1x128xf32, #tpu.memory_space<vmem>>, vector<1x128xf32>
    %43 = arith.addf %41, %42 : vector<1x128xf32>
    %44 = arith.mulf %43, %43 : vector<1x128xf32>
    %cst_37 = arith.constant dense<0.000000e+00> : vector<1xf32>
    %45 = vector.multi_reduction <add>, %44, %cst_37 [1] : vector<1x128xf32> to vector<1xf32>
    %46 = vector.shape_cast %45 : vector<1xf32> to vector<1x1xf32>
    %47 = math.sqrt %46 : vector<1x1xf32>
    %cst_38 = arith.constant 9.99999996E-13 : f32
    %48 = vector.broadcast %cst_38 : f32 to vector<1x1xf32>
    %49 = arith.maximumf %47, %48 : vector<1x1xf32>
    %50 = vector.broadcast %49 : vector<1x1xf32> to vector<1x128xf32>
    %51 = arith.divf %43, %50 : vector<1x128xf32>
    %c0_39 = arith.constant 0 : index
    %c0_40 = arith.constant 0 : index
    %c0_41 = arith.constant 0 : index
    %52 = vector.load %arg15[%c0_39, %c0_40, %c0_41] : memref<1x1x128xf32, #tpu.memory_space<vmem>>, vector<1x1x128xf32>
    %53 = vector.shape_cast %52 : vector<1x1x128xf32> to vector<1x128xf32>
    %54 = vector.shape_cast %51 : vector<1x128xf32> to vector<1x1x128xf32>
    tpu.vector_store %arg15[%c0_39, %c0_40, %c0_41], %54 {strides = array<i32>} : memref<1x1x128xf32, #tpu.memory_space<vmem>>, vector<1x1x128xf32>,
    return
  }
  func.func @transform_0(%arg0: i32, %arg1: memref<2xi32, #tpu.memory_space<smem>>) -> (i32, i32, i32, i32) {
    %c0_i32 = arith.constant 0 : i32
    %c0_i32_0 = arith.constant 0 : i32
    %c0_i32_1 = arith.constant 0 : i32
    %c0_i32_2 = arith.constant 0 : i32
    return %arg0, %c0_i32, %c0_i32_0, %c0_i32_1 : i32, i32, i32, i32
  }
  func.func @transform_1(%arg0: i32, %arg1: memref<2xi32, #tpu.memory_space<smem>>) -> (i32, i32, i32, i32) {
    %c0_i32 = arith.constant 0 : i32
    %c0_i32_0 = arith.constant 0 : i32
    %c0_i32_1 = arith.constant 0 : i32
    %c0_i32_2 = arith.constant 0 : i32
    return %arg0, %c0_i32, %c0_i32_0, %c0_i32_1 : i32, i32, i32, i32
  }
  func.func @transform_2(%arg0: i32, %arg1: memref<2xi32, #tpu.memory_space<smem>>) -> (i32, i32) {
    %c0_i32 = arith.constant 0 : i32
    %c0_i32_0 = arith.constant 0 : i32
    %c0_i32_1 = arith.constant 0 : i32
    return %c0_i32, %c0_i32_0 : i32, i32
  }
  func.func @transform_3(%arg0: i32, %arg1: memref<2xi32, #tpu.memory_space<smem>>) -> (i32, i32) {
    %c0_i32 = arith.constant 0 : i32
    %c0_i32_0 = arith.constant 0 : i32
    %c0_i32_1 = arith.constant 0 : i32
    return %c0_i32, %c0_i32_0 : i32, i32
  }
  func.func @transform_4(%arg0: i32, %arg1: memref<2xi32, #tpu.memory_space<smem>>) -> (i32, i32) {
    %c0_i32 = arith.constant 0 : i32
    %c0_i32_0 = arith.constant 0 : i32
    %c0_i32_1 = arith.constant 0 : i32
    return %c0_i32, %c0_i32_0 : i32, i32
  }
  func.func @transform_5(%arg0: i32, %arg1: memref<2xi32, #tpu.memory_space<smem>>) -> (i32, i32) {
    %c0_i32 = arith.constant 0 : i32
    %c0_i32_0 = arith.constant 0 : i32
    %c0_i32_1 = arith.constant 0 : i32
    return %c0_i32, %c0_i32_0 : i32, i32
  }
  func.func @transform_6(%arg0: i32, %arg1: memref<2xi32, #tpu.memory_space<smem>>) -> (i32, i32) {
    %c0_i32 = arith.constant 0 : i32
    %c0_i32_0 = arith.constant 0 : i32
    %c0_i32_1 = arith.constant 0 : i32
    return %c0_i32, %c0_i32_0 : i32, i32
  }
  func.func @transform_7(%arg0: i32, %arg1: memref<2xi32, #tpu.memory_space<smem>>) -> (i32, i32) {
    %c0_i32 = arith.constant 0 : i32
    %c0_i32_0 = arith.constant 0 : i32
    %c0_i32_1 = arith.constant 0 : i32
    return %c0_i32, %c0_i32_0 : i32, i32
  }
  func.func @transform_8(%arg0: i32, %arg1: memref<2xi32, #tpu.memory_space<smem>>) -> (i32, i32) {
    %c0_i32 = arith.constant 0 : i32
    %c0_i32_0 = arith.constant 0 : i32
    %c0_i32_1 = arith.constant 0 : i32
    return %c0_i32, %c0_i32_0 : i32, i32
  }
  func.func @transform_9(%arg0: i32, %arg1: memref<2xi32, #tpu.memory_space<smem>>) -> (i32, i32) {
    %c0_i32 = arith.constant 0 : i32
    %c0_i32_0 = arith.constant 0 : i32
    %c0_i32_1 = arith.constant 0 : i32
    return %c0_i32, %c0_i32_0 : i32, i32
  }
  func.func @transform_10(%arg0: i32, %arg1: memref<2xi32, #tpu.memory_space<smem>>) -> (i32, i32) {
    %c0_i32 = arith.constant 0 : i32
    %c0_i32_0 = arith.constant 0 : i32
    %c0_i32_1 = arith.constant 0 : i32
    return %c0_i32, %c0_i32_0 : i32, i32
  }
  func.func @transform_11(%arg0: i32, %arg1: memref<2xi32, #tpu.memory_space<smem>>) -> (i32, i32) {
    %c0_i32 = arith.constant 0 : i32
    %c0_i32_0 = arith.constant 0 : i32
    %c0_i32_1 = arith.constant 0 : i32
    return %c0_i32, %c0_i32_0 : i32, i32
  }
  func.func @transform_12(%arg0: i32, %arg1: memref<2xi32, #tpu.memory_space<smem>>) -> (i32, i32) {
    %c0_i32 = arith.constant 0 : i32
    %c0_i32_0 = arith.constant 0 : i32
    %c0_i32_1 = arith.constant 0 : i32
    return %c0_i32, %c0_i32_0 : i32, i32
  }
  func.func @transform_13(%arg0: i32, %arg1: memref<2xi32, #tpu.memory_space<smem>>) -> (i32, i32, i32) {
    %c0_i32 = arith.constant 0 : i32
    %c0_i32_0 = arith.constant 0 : i32
    %c0_i32_1 = arith.constant 0 : i32
    return %arg0, %c0_i32, %c0_i32_0 : i32, i32, i32
  }
}

</mosaic_0001>

<bundles_post_ra>
// kernel: tpu_custom_call.1
= control target key start
LH: loop header
LB: loop body
LE: loop exit
PB: predicated region body
PF: predicated region fallthrough
CT: control target
= control target key end

     0   :  { %s2065_s16 = smov [#allocation5]   ;;  %s2460_s0 = inlined_call_operand.vmem [shape: s32[2], index: 0, kind: input, shape index: {}]   ;;  %s2461_s1 = inlined_call_operand.vmem [shape: bf16[2,9,8,8], index: 1, kind: input, shape index: {}]   ;;  %s2462_s2 = inlined_call_operand.vmem [shape: bf16[2,9,8,8], index: 2, kind: input, shape index: {}]   ;;  %s2463_s3 = inlined_call_operand.vmem [shape: bf16[8,32], index: 3, kind: input, shape index: {}]   ;;  %s2464_s4 = inlined_call_operand.vmem [shape: bf16[8,32], index: 4, kind: input, shape index: {}]   ;;  %s2465_s5 = inlined_call_operand.vmem [shape: f32[1,32], index: 5, kind: input, shape index: {}]   ;;  %s2466_s6 = inlined_call_operand.hbm [shape: bf16[512,128], index: 6, kind: input, shape index: {}]   ;;  %s2467_s7 = inlined_call_operand.vmem [shape: f32[1,128], index: 7, kind: input, shape index: {}]   ;;  %s2468_s8 = inlined_call_operand.vmem [shape: f32[128,128], index: 8, kind: input, shape index: {}]   ;;  %s2469_s9 = inlined_call_operand.vmem [shape: f32[1,128], index: 9, kind: input, shape index: {}]   ;;  %s2470_s10 = inlined_call_operand.hbm [shape: f32[128,128], index: 10, kind: input, shape index: {}]   ;;  %s2471_s11 = inlined_call_operand.vmem [shape: f32[1,128], index: 11, kind: input, shape index: {}]   ;;  %s2472_s12 = inlined_call_operand.hbm [shape: f32[128,128], index: 12, kind: input, shape index: {}]   ;;  %s2473_s13 = inlined_call_operand.vmem [shape: f32[1,128], index: 13, kind: input, shape index: {}]   ;;  %s2474_s14 = inlined_call_operand.hbm [shape: f32[2,1,128], index: 14, kind: output, shape index: {}]  }
   0x1   :  { %2481 = sst [smem:[#allocation23_spill]] %s2466_s6  ;;  %s20_s15 = sshll.u32 %s2460_s0, 4  ;;  %s21_s15 = int_to_ptr.vmem [resolvable:$true] %s20_s15 }
   0x2   :  { %2482 = sst [smem:[#allocation24_spill]] %s2470_s10 }
   0x3   :  { %23 = dma.vmem_to_smem %s21_s15, 16, %s2065_s16, [#allocation4] }
   0x4   :  { %2023 = dma.done.wait [#allocation4], 16 }
   0x5   :  { %2024 = vsyncadd [#allocation4], 4294967280 }
   0x6   :  { %26 = sfence }
   0x7   :  { %27 = vsyncpa [#allocation7], 0 }
   0x8   :  { %28 = vsyncpa [#allocation10], 0 }
   0x9   :  { %29 = vsyncpa [#allocation8], 0 }
   0xa   :  { %31 = vsyncpa [#allocation8 + $0x1], 0  ;;  %s2156_s17 = smov 0   ;;  %s2158_s18 = smov 0  }
   0xb   :  { %s2160_s19 = smov 0   ;;  %s2162_s20 = smov 0  }
   0xc LB: > { %2483 = sst [smem:[#allocation17_spill]] %s2039_s17  ;;  %s2177_s0 = sadd.s32 4294967295, %s2051_s20   ;;  %s2051_s20 = sphi %s2162_s20, %s2504_s20   ;;  %s2047_s19 = sphi %s2160_s19, %s2506_s19   ;;  %s2043_s18 = sphi %s2158_s18, %s2508_s18   ;;  %s2039_s17 = sphi %s2156_s17, %s2507_s17  }
   0xd   : > { %2484 = sst [smem:[#allocation18_spill]] %s2047_s19  ;;  %s1530_s21 = sadd.s32 4294967294, %s2051_s20  }
   0xe   : > { %2485 = sst [smem:[#allocation19_spill]] %s2051_s20  ;;  %s2181_s22 = sadd.s32 1, %s2051_s20  }
   0xf   : > { %2486 = sst [smem:[#allocation20_spill]] %s2181_s22  ;;  %s327_s23 = sadd.s32 1, %s2047_s19 }
  0x10   : > { %s324_s24 = ssub.s32 %s2051_s20, %s2181_s22  ;;  %p337_p0 = scmp.ne.s32.totalorder %s2047_s19, %s2043_s18 }
  0x11   : > { %p325_p1 = scmp.eq.s32.totalorder %s324_s24, 0  ;;  %p338_p2 = scmp.eq.s32.totalorder %s2177_s0, 1 }
  0x12   : > { %p343_p3 = scmp.ne.s32.totalorder %s2043_s18, %s2039_s17  ;;  %p344_p4 = scmp.eq.s32.totalorder %s1530_s21, 1 }
  0x13   : > { %s2192_s25 = scalar_select %p325_p1, %s2047_s19, %s327_s23  }
  0x14   : > { %p2194_p5 = por %p338_p2, %p337_p0  ;;  %p2198_p6 = por %p344_p4, %p343_p3 }
  0x15   : > { %2487 = sst [smem:[#allocation21_spill]] %s2192_s25  ;;  %p1531_p7 = scmp.ge.s32.totalorder %s2051_s20, 1 }
  0x16   : > { %s2489_s27 = scalar_select %p2198_p6, 1, 0 }
  0x17   : > { %p351_p8 = scmp.lt.s32.totalorder %s2051_s20, 3  ;;  %p1783_p9 = scmp.eq.s32.totalorder %s2177_s0, 0 }
  0x18   : > { %2490 = sst [smem:[#allocation22_spill]] %s2489_s27  ;;  %s2066_s16 = smov [#allocation9]  }
  0x19   : > { %p2205_p10 = pnand %p1531_p7, %p351_p8  ;;  %s2492_s10 = sld [smem:[#allocation24_spill]] }
  0x1a   : > { %s396_s21 = sshll.u32 %s2066_s16, 4  ;;  %s2494_s6 = sld [smem:[#allocation23_spill]]  ;;  %s397_s21 = int_to_ptr.vmem [resolvable:$true] %s396_s21 }
  0x1b   : > { %p1769_p11 = pneg %p2205_p10  ;;  %s2067_s29 = smov 128  }
  0x1c   : > { %s2068_s30 = smov 8   ;;  %s2070_s22 = smov 64  }
  0x1d   : > { %p2216_p12 = pnand %p1783_p9, %p1769_p11  ;;  %s2071_s27 = smov 4  }
  0x1e   : > { %s411_s25 = sshll.u32 %s2472_s12, 4  ;;  %s2072_s24 = smov [#allocation11]   ;;  %s412_s25 = int_to_ptr.hbm [resolvable:$true] %s411_s25 }
  0x1f   : > { %s394_s15 = sshll.u32 %s2492_s10, 4  ;;  %s2069_s10 = smov [#allocation6]   ;;  %s395_s15 = int_to_ptr.hbm [resolvable:$true] %s394_s15 }
  0x20   : > { %s371_s19 = sshll.u32 %s2494_s6, 4  ;;  %s373_s16 = sshll.u32 %s2069_s10, 4  ;;  %s372_s19 = int_to_ptr.hbm [resolvable:$true] %s371_s19  ;;  %s374_s16 = int_to_ptr.vmem [resolvable:$true] %s373_s16 }
  0x21   : > { %1775 = dma.hbm_to_vmem [thread:$0]  (!%p2216_p12), %s395_s15, 2048, %s397_s21, [#allocation10], %s2067_s29, %s2067_s29, %s2068_s30  }
  0x22   : > { %1772 = dma.hbm_to_vmem [thread:$0]  (!%p2216_p12), %s372_s19, 4096, %s374_s16, [#allocation7], %s2070_s22, %s2070_s22, %s2071_s27  }
  0x23   : > { %s413_s6 = sshll.u32 %s2072_s24, 4  ;;  %448 = sbr.rel (%p2205_p10) target bundleno = 1226 (0x4ca), region = 72  ;;  %s414_s6 = int_to_ptr.vmem [resolvable:$true] %s413_s6 }
  0x24   : > { %1778 = dma.hbm_to_vmem [thread:$0]  (!%p2216_p12), %s412_s25, 2048, %s414_s6, [#allocation10], %s2067_s29, %s2067_s29, %s2068_s30  }
  0x28   : > { %2026 = dma.done.wait (%p1783_p9), [#allocation7], 4096  }
  0x29   : > { %2028 = vsyncadd (%p1783_p9), [#allocation7], 4294963200 }
  0x2a   : > { %2030 = dma.done.wait (%p1783_p9), [#allocation10], 4096  }
  0x2b   : > { %2032 = vsyncadd (%p1783_p9), [#allocation10], 4294963200  ;;  %s505_s10 = sand.u32 1, %s2043_s18   ;;  %p507_p13 = scmp.lt.s32.totalorder %s2177_s0, 1  ;;  %v2073_v0 = vmov 0   ;;  %vm519_vm0 = vcmask 1040384  }
  0x2c   : > { %518 = vst [vmem:[#allocation2] sm:$0xf] %v2073_v0  ;;  %vm520_vm1 = vsmask.f32 256  ;;  %v2264_v2 = vld [vmem:[%s2463_s3] sm:$0xf] }
  0x2d   : > { %s508_s6 = scalar_select %p507_p13, %s2177_s0, 1  ;;  %525 = vst [vmem:[#allocation2 + $0x8] sm:$0xf] %v2073_v0  ;;  %vm2257_vm2 = vmand %vm519_vm0, %vm520_vm1  ;;  %v2269_v3 = vld [vmem:[%s2464_s4] sm:$0xf] }
  0x2e   : > { %529 = vst [vmem:[#allocation2 + $0x10] sm:$0xf] %v2073_v0  ;;  %v2274_v4 = vld [vmem:[%s2465_s5] sm:$0x1]  ;;  %v522_v5 = vld [vmem:[#allocation2 + $0x4] sm:$0x1] }
  0x2f   : > { %s1752_s17 = smul.u32 36, %s508_s6  ;;  %533 = vst [vmem:[#allocation2 + $0x18] sm:$0xf] %v2073_v0  ;;  %v526_v6 = vld [vmem:[#allocation2 + $0xc] sm:$0x1]  ;;  %v523_v8 = vsel %vm2257_vm2, 0, %v522_v5 }
  0x30   : > { %537 = vst [vmem:[#allocation2 + $0x20] sm:$0xf] %v2073_v0  ;;  %v530_v7 = vld [vmem:[#allocation2 + $0x14] sm:$0x1]  ;;  %v527_v9 = vsel %vm2257_vm2, 0, %v526_v6  ;;  %s2288_s24 = scalar_lea.vmem [#allocation12], %s505_s10 }
  0x31   : > { %s2248_s22 = scalar_lea.vmem %s2461_s1, %s1752_s17  ;;  %s2253_s15 = scalar_lea.vmem %s2462_s2, %s1752_s17  ;;  %v531_v10 = vsel %vm2257_vm2, 0, %v530_v7  ;;  %v534_v11 = vld [vmem:[#allocation2 + $0x1c] sm:$0x1]  ;;  %524 = vst [vmem:[#allocation2 + $0x4] sm:$0x1] %v523_v8 }
  0x32   : > { %v535_v12 = vsel %vm2257_vm2, 0, %v534_v11  ;;  %v538_v13 = vld [vmem:[#allocation2 + $0x24] sm:$0x1]  ;;  %528 = vst [vmem:[#allocation2 + $0xc] sm:$0x1] %v527_v9  ;;  %s2290_s6 = smov 0  }
  0x33   : > { %v539_v14 = vsel %vm2257_vm2, 0, %v538_v13  ;;  %532 = vst [vmem:[#allocation2 + $0x14] sm:$0x1] %v531_v10 }
  0x34   : > { %536 = vst [vmem:[#allocation2 + $0x1c] sm:$0x1] %v535_v12 }
  0x35   : > { %540 = vst [vmem:[#allocation2 + $0x24] sm:$0x1] %v539_v14 }
  0x36 LB: >> { %vm562_vm3 = vcmask 1043456   ;;  %s2298_s17 = sshll.u32 %s2055_s6, 3  ;;  %vm558_vm4 = vcmask 64512   ;;  %v637_v25 = vperm.slane %v2274_v4, 0  ;;  %s2074_s27 = smov 96   ;;  %vm782_vm5 = vcmask 253952   ;;  %s2055_s6 = sphi %s2290_s6, %s549_s6  }
  0x37   : >> { %v564_v15 = vsel %vm562_vm3, %v2269_v3, 0  ;;  %v583_v16 = vsel %vm562_vm3, %v2264_v2, 0  ;;  %s552_s19 = scalar_lea.vmem %s2248_s22, %s2298_s17  ;;  %s599_s20 = scalar_lea.vmem %s2253_s15, %s2298_s17  ;;  %vm783_vm6 = vmand %vm782_vm5, %vm520_vm1  ;;  %vm651_vm7 = vcmask 1044224   ;;  %vm667_vm8 = vcmask 781824  }
  0x38   : >> { %573 = vmatpush.bf16.msra.mxu0 %v564_v15  ;;  %592 = vmatpush.bf16.msra.mxu1 %v583_v16  ;;  %v1546_v17 = vld [vmem:[%s552_s19 + $0x4] sm:$0xf]  ;;  %v553_v18 = vld [vmem:[%s552_s19] sm:$0xf]  ;;  %v1559_v21 = vld [vmem:[%s552_s19 + $0x8] sm:$0xf] }
  0x39   : >> { %614 = vmatpush.bf16.msra.mxu2 %v564_v15  ;;  %630 = vmatpush.bf16.msra.mxu3 %v583_v16  ;;  %v1552_v19 = vld [vmem:[%s599_s20 + $0x4] sm:$0xf]  ;;  %v600_v20 = vld [vmem:[%s599_s20] sm:$0xf]  ;;  %v1565_v23 = vld [vmem:[%s599_s20 + $0x8] sm:$0xf] }
  0x3a   : >> { %v1556_v22 = vld [vmem:[%s552_s19 + $0x4] sm:$0xf]  ;;  %s2075_s28 = smov 64   ;;  %s2076_s21 = smov 32   ;;  %vm668_vm9 = vsmask.f32 7938 }
  0x3b   : >> { %1547 = vmatmul.msk.bf16.vlgmr.msra.gmra.mxu0 %vm558_vm4, %v1546_v17  ;;  %1548 = vmatmul.msk.bf16.vlgmr.msra.gmra.mxu1 %vm558_vm4, %v553_v18  ;;  %v1562_v24 = vld [vmem:[%s599_s20 + $0x4] sm:$0xf]  ;;  %s650_s23 = scalar_lea.vmem [#allocation2], %s2298_s17  ;;  %vm669_vm10 = vmand %vm667_vm8, %vm668_vm9  ;;  %vm765_vm11 = vcmask 519424   ;;  %vm673_vm12 = vcmask 778752   ;;  %vm777_vm13 = vcmask 257024  }
  0x3c   : >> { %693 = vmatpush.bf16.msrb.mxu0 %v564_v15  ;;  %709 = vmatpush.bf16.msrb.mxu1 %v583_v16  ;;  %v1572_v1 = vld [vmem:[%s650_s23 + $0xc] sm:$0x1]  ;;  %vm674_vm14 = vmand %vm673_vm12, %vm520_vm1  ;;  %v675_v13 = vld [vmem:[%s650_s23 + $0x4] sm:$0x1]  ;;  %s549_s6 = sadd.s32 1, %s2055_s6  }
  0x3d   : >> { %1553 = vmatmul.msk.bf16.vlgmr.msra.gmra.mxu2 %vm558_vm4, %v1552_v19  ;;  %1554 = vmatmul.msk.bf16.vlgmr.msra.gmra.mxu3 %vm558_vm4, %v600_v20  ;;  %vm778_vm15 = vmand %vm777_vm13, %vm668_vm9  ;;  %p546_p0 = scmp.ge.s32.totalorder %s549_s6, 4  }
  0x3e   : >> { %729 = vmatpush.bf16.msrb.mxu2 %v564_v15  ;;  %745 = vmatpush.bf16.msrb.mxu3 %v583_v16  ;;  %s2322_s29 = sld [smem:[#allocation5 + %s2177_s0]] (%p546_p0)  ;;  %v788_v19 = vlaneseq (%p546_p0)  ;;  %v2327_v20 = vld [vmem:[%s2467_s7] sm:$0x1] (%p546_p0)  ;;  %s2334_s25 = smov (%p546_p0), 0  }
  0x4b   : >> { %1560 = vmatmul.msk.bf16.vlgmr.msrb.gmra.mxu0 %vm558_vm4, %v1559_v21  ;;  %1561 = vmatmul.msk.bf16.vlgmr.msrb.gmra.mxu1 %vm558_vm4, %v1556_v22  ;;  %v789_v21 = vand.u32 (%p546_p0), 127, %v788_v19  ;;  %v790_v22 = vstv (%p546_p0), %s2322_s29 }
  0x4d   : >> { %1566 = vmatmul.msk.bf16.vlgmr.msrb.gmra.mxu2 %vm558_vm4, %v1565_v23  ;;  %1567 = vmatmul.msk.bf16.vlgmr.msrb.gmra.mxu3 %vm558_vm4, %v1562_v24  ;;  %vm791_vm2 = vcmp.lt.s32.totalorder (%p546_p0), %v789_v21, %v790_v22  ;;  %v2077_v23 = vmov (%p546_p0), 0.0  }
  0x4e   : > { %v2330_v24 = vsel (%p546_p0), %vm791_vm2, 1.0, %v2077_v23 }
  0xb8   : >> { %v575_v26 = vpop.f32.mrf.mxu0  ;;  %v594_v27 = vpop.f32.mrf.mxu1 }
  0xb9   : >> { %v595_v28 = vadd.f32 %v594_v27, %v575_v26 }
  0xbb   : >> { %v639_v29 = vadd.f32 %v637_v25, %v595_v28 }
  0xbd   : >> { %v640_v30 = vmax.f32 %v639_v29, 0.0 }
  0xbf   : >> { %v641_v33 = vpack.c.bf16 %v640_v30, %v640_v30 }
  0xc0   : >> { %v616_v31 = vpop.f32.mrf.mxu2  ;;  %v632_v32 = vpop.f32.mrf.mxu3 }
  0xc1   : >> { %v633_v34 = vadd.f32 %v632_v32, %v616_v31  ;;  %v577_v35 = vpop.f32.mrf.mxu0  ;;  %v596_v36 = vpop.f32.mrf.mxu1  ;;  %646 = vrot.lane.b32.xlu0 %v641_v33, %s2074_s27 }
  0xc3   : >> { %v642_v37 = vadd.f32 %v637_v25, %v633_v34 }
  0xc5   : >> { %v643_v38 = vmax.f32 %v642_v37, 0.0 }
  0xc7   : >> { %v644_v39 = vpack.c.bf16 %v643_v38, %v643_v38 }
  0xc8   : >> { %v618_v40 = vpop.f32.mrf.mxu2  ;;  %v634_v41 = vpop.f32.mrf.mxu3 }
  0xc9   : >> { %v695_v42 = vpop.f32.mrf.mxu0  ;;  %v711_v43 = vpop.f32.mrf.mxu1  ;;  %v654_v44 = vshrl.u32 %v644_v39, 16  ;;  %v657_v45 = vshll.u32 %v644_v39, 16 }
  0xca   : >> { %v712_v46 = vadd.f32 %v711_v43, %v695_v42 }
  0xcb   : >> { %v656_v47 = vrot.slane %v654_v44, 7 }
  0xcc   : >> { %v751_v48 = vadd.f32 %v712_v46, %v637_v25 }
  0xcd   : >> { %v659_v49 = vor.u32 %v657_v45, %v656_v47  ;;  %v660_v54 = vrot.slane %v656_v47, 4 }
  0xce   : >> { %v752_v50 = vmax.f32 %v751_v48, 0.0 }
  0xcf   : >> { %661 = vrot.lane.b32.xlu1 %v659_v49, %s2075_s28 }
  0xd0   : >> { %v753_v51 = vpack.c.bf16 %v752_v50, %v752_v50  ;;  %v731_v55 = vpop.f32.mrf.mxu2  ;;  %v747_v56 = vpop.f32.mrf.mxu3 }
  0xd1   : >> { %v697_v52 = vpop.f32.mrf.mxu0  ;;  %v713_v53 = vpop.f32.mrf.mxu1  ;;  %v748_v57 = vadd.f32 %v747_v56, %v731_v55 }
  0xd2   : >> { %759 = vrot.lane.b32.xlu0 %v753_v51, %s2076_s21 }
  0xd3   : >> { %v754_v58 = vadd.f32 %v748_v57, %v637_v25  ;;  %v2332_v25 = vmov (%p546_p0), 0.0  }
  0xd5   : >> { %v755_v59 = vmax.f32 %v754_v58, 0.0 }
  0xd7   : >> { %663 = vrot.lane.b32.xlu1 %v660_v54, %s2075_s28  ;;  %v756_v60 = vpack.c.bf16 %v755_v59, %v755_v59 }
  0xd8   : >> { %v733_v61 = vpop.f32.mrf.mxu2  ;;  %v749_v62 = vpop.f32.mrf.mxu3 }
  0xd9   : >> { %v768_v63 = vshrl.u32 %v756_v60, 16  ;;  %v771_v12 = vshll.u32 %v756_v60, 16 }
  0xdb   : >> { %v770_v0 = vrot.slane %v768_v63, 7 }
  0xdd   : >> { %v774_v5 = vrot.slane %v770_v0, 4  ;;  %v773_v16 = vor.u32 %v771_v12, %v770_v0 }
  0xdf   : >> { %v785_v6 = vsel %vm783_vm6, %v774_v5, %v1572_v1 }
  0xe0   : >> { %1573 = vst [vmem:[%s650_s23 + $0xc] sm:$0x1] %v785_v6 }
 0x133   : >> { %v647_v7 = vpop.permute.xlu0 %646 }
 0x134   : >> { %652 = vst.msk [vmem:[%s650_s23] sm:$0xf] %vm651_vm7, %v647_v7 }
 0x13b   : >> { %v670_v9 = vld [vmem:[%s650_s23] sm:$0xf] }
 0x141   : >> { %v662_v8 = vpop.permute.xlu1 %661 }
 0x142   : >> { %v671_v10 = vsel %vm669_vm10, %v662_v8, %v670_v9 }
 0x143   : >> { %672 = vst [vmem:[%s650_s23] sm:$0xf] %v671_v10 }
 0x144   : >> { %v760_v11 = vpop.permute.xlu0 %759 }
 0x145   : >> { %1569 = vst.msk [vmem:[%s650_s23 + $0x8] sm:$0xf] %vm765_vm11, %v760_v11 }
 0x149   : >> { %v664_v14 = vpop.permute.xlu1 %663 }
 0x14a   : >> { %v676_v15 = vsel %vm674_vm14, %v664_v14, %v675_v13  ;;  %548 = sbr.rel (!%p546_p0) target bundleno = 54 (0x36), region = 147 }
 0x14b   : >> { %677 = vst [vmem:[%s650_s23 + $0x4] sm:$0x1] %v676_v15 }
 0x14c   : >> { %v1570_v17 = vld [vmem:[%s650_s23 + $0x8] sm:$0xf] }
 0x14d   : >> { %v780_v18 = vsel %vm778_vm15, %v773_v16, %v1570_v17 }
 0x14e   : >> { %1571 = vst [vmem:[%s650_s23 + $0x8] sm:$0xf] %v780_v18 }
 0x14f LB: >> { %v1727_v2 = vld [vmem:[#allocation6 + $0x38] sm:$0xff]  ;;  %v1726_v27 = vld [vmem:[#allocation6 + $0x30] sm:$0xff]  ;;  %s1719_s22 = sshll.u32 %s2063_s25, 3  ;;  %v1725_v31 = vld [vmem:[#allocation6 + $0x28] sm:$0xff]  ;;  %vm809_vm1 = vsmask.f32 3328  ;;  %s2063_s25 = sphi %s2334_s25, %s800_s25   ;;  %v2059_v25 = vphi %v2332_v25, %v2500_v25  }
 0x150   : >> { %v1735_v3 = vld [vmem:[#allocation6 + $0x78] sm:$0xff]  ;;  %1127 = vmatpush.bf16.msra.mxu0 %v1727_v2  ;;  %v1734_v28 = vld [vmem:[#allocation6 + $0x70] sm:$0xff]  ;;  %v1733_v32 = vld [vmem:[#allocation6 + $0x68] sm:$0xff]  ;;  %s804_s15 = scalar_lea.vmem [#allocation2], %s1719_s22  ;;  %vm810_vm3 = vsmask.f32 7440 }
 0x151   : >> { %v1743_v4 = vld [vmem:[#allocation6 + $0xb8] sm:$0xff]  ;;  %1140 = vmatpush.bf16.msra.mxu1 %v1735_v3  ;;  %v1742_v29 = vld [vmem:[#allocation6 + $0xb0] sm:$0xff]  ;;  %v1741_v33 = vld [vmem:[#allocation6 + $0xa8] sm:$0xff]  ;;  %s800_s25 = sadd.s32 1, %s2063_s25  }
 0x152   : >> { %v1751_v26 = vld [vmem:[#allocation6 + $0xf8] sm:$0xff]  ;;  %1153 = vmatpush.bf16.msra.mxu2 %v1743_v4  ;;  %v1750_v30 = vld [vmem:[#allocation6 + $0xf0] sm:$0xff]  ;;  %v1749_v34 = vld [vmem:[#allocation6 + $0xe8] sm:$0xff]  ;;  %p797_p1 = scmp.ge.s32.totalorder %s800_s25, 4  }
 0x153   : >> { %1166 = vmatpush.bf16.msra.mxu3 %v1751_v26  ;;  %v1724_v35 = vld [vmem:[#allocation6 + $0x20] sm:$0xff]  ;;  %v1723_v48 = vld [vmem:[#allocation6 + $0x18] sm:$0xff]  ;;  %vm2345_vm5 = vmor %vm809_vm1, %vm810_vm3  ;;  %s1205_s6 = scvt.s32.f32 (%p797_p1), %s2322_s29  ;;  %s1385_s17 = scalar_lea.hbm (%p797_p1), %s2474_s14, %s2177_s0 }
 0x154   : >> { %1128 = vmatpush.bf16.msra.mxu0 %v1726_v27  ;;  %v1732_v36 = vld [vmem:[#allocation6 + $0x60] sm:$0xff]  ;;  %v1731_v49 = vld [vmem:[#allocation6 + $0x58] sm:$0xff]  ;;  %v1722_v62 = vld [vmem:[#allocation6 + $0x10] sm:$0xff]  ;;  %s1387_s19 = sshll.u32 (%p797_p1), %s2288_s24, 4  ;;  %s1389_s20 = sshll.u32 (%p797_p1), %s1385_s17, 4  ;;  %s1388_s19 = int_to_ptr.vmem [resolvable:$true] %s1387_s19  ;;  %s1390_s20 = int_to_ptr.hbm [resolvable:$true] %s1389_s20 }
 0x155   : >> { %1141 = vmatpush.bf16.msra.mxu1 %v1734_v28  ;;  %v1740_v37 = vld [vmem:[#allocation6 + $0xa0] sm:$0xff]  ;;  %v805_v39 = vld [vmem:[%s804_s15] sm:$0xf]  ;;  %v808_v41 = vld [vmem:[%s804_s15 + $0x4] sm:$0x1]  ;;  %s1206_s28 = smul.f32 (%p797_p1), 4.0, %s1205_s6 }
 0x156   : >> { %1154 = vmatpush.bf16.msra.mxu2 %v1742_v29  ;;  %v1748_v38 = vld [vmem:[#allocation6 + $0xe0] sm:$0xff]  ;;  %806 = vst [vmem:[#allocation3] sm:$0xf] %v805_v39  ;;  %v807_v40 = vld [vmem:[%s804_s15] sm:$0xf]  ;;  %v822_v44 = vshll.u32 %v808_v41, 16 }
 0x157   : >> { %1167 = vmatpush.bf16.msra.mxu3 %v1750_v30  ;;  %v813_v42 = vshrl.u32 %v807_v40, 16  ;;  %v816_v43 = vshll.u32 %v807_v40, 16  ;;  %v1578_v45 = vld [vmem:[%s804_s15 + $0x8] sm:$0xf]  ;;  %v1580_v47 = vld [vmem:[%s804_s15 + $0xc] sm:$0x1] }
 0x158   : >> { %1129 = vmatpush.bf16.msra.mxu0 %v1725_v31  ;;  %833 = vst [vmem:[#allocation3 + $0x8] sm:$0xf] %v1578_v45  ;;  %v1579_v46 = vld [vmem:[%s804_s15 + $0x8] sm:$0xf]  ;;  %v1739_v53 = vld [vmem:[#allocation6 + $0x98] sm:$0xff]  ;;  %v846_v56 = vshll.u32 %v1580_v47, 16  ;;  %v1207_v47 = vstv (%p797_p1), %s1206_s28 }
 0x159   : >> { %1142 = vmatpush.bf16.msra.mxu1 %v1733_v32  ;;  %v815_v50 = vrot.slane %v813_v42, 4  ;;  %v818_v51 = vrot.slane %v816_v43, 5  ;;  %v837_v52 = vshrl.u32 %v1579_v46, 16  ;;  %v1747_v54 = vld [vmem:[#allocation6 + $0xd8] sm:$0xff]  ;;  %v840_v55 = vshll.u32 %v1579_v46, 16  ;;  %v1730_v63 = vld [vmem:[#allocation6 + $0x50] sm:$0xff] }
 0x15a   : >> { %1155 = vmatpush.bf16.msra.mxu2 %v1741_v33  ;;  %v824_v58 = vrot.slane %v822_v44, 5  ;;  %v1738_v1 = vld [vmem:[#allocation6 + $0x90] sm:$0xff]  ;;  %v848_v7 = vrot.slane %v846_v56, 5  ;;  %v1721_v10 = vld [vmem:[#allocation6 + $0x8] sm:$0xff]  ;;  %v1720_v15 = vld [vmem:[#allocation6] sm:$0xff]  ;;  %v919_v29 = vperm.slane %v2327_v20, 0  ;;  %1859 = vrcp.f32 (%p797_p1), %v1207_v47 }
 0x15b   : >> { %1168 = vmatpush.bf16.msra.mxu3 %v1749_v34  ;;  %v819_v57 = vor.u32 %v818_v51, %v815_v50  ;;  %v839_v59 = vrot.slane %v837_v52, 4  ;;  %v842_v61 = vrot.slane %v840_v55, 5  ;;  %v1746_v5 = vld [vmem:[#allocation6 + $0xd0] sm:$0xff]  ;;  %v1729_v11 = vld [vmem:[#allocation6 + $0x48] sm:$0xff]  ;;  %v1728_v16 = vld [vmem:[#allocation6 + $0x40] sm:$0xff]  ;;  %s1377_s27 = scalar_lea.sflag (%p797_p1), [#allocation8], %s505_s10 }
 0x15c   : >> { %1130 = vmatpush.bf16.msra.mxu0 %v1724_v35  ;;  %v1737_v12 = vld [vmem:[#allocation6 + $0x88] sm:$0xff]  ;;  %v1736_v17 = vld [vmem:[#allocation6 + $0x80] sm:$0xff]  ;;  %v1239_v46 = vld [vmem:[%s2468_s8 + $0x70] sm:$0xff] (%p797_p1)  ;;  %v1217_v55 = vand.u32 (%p797_p1), 2147483647, %v1207_v47  ;;  %s1981_s28 = sshra.s32 (%p797_p1), %s1390_s20, 4  ;;  %s1982_s28 = int_to_ptr.hbm [resolvable:$true] %s1981_s28 }
 0x15d   : >> { %1143 = vmatpush.bf16.msra.mxu1 %v1732_v36  ;;  %v820_v0 = vrot.slane %v819_v57, 4  ;;  %v843_v6 = vor.u32 %v842_v61, %v839_v59  ;;  %v1745_v13 = vld [vmem:[#allocation6 + $0xc8] sm:$0xff]  ;;  %v1744_v18 = vld [vmem:[#allocation6 + $0xc0] sm:$0xff]  ;;  %v1230_v61 = vld [vmem:[%s2468_s8 + $0x28] sm:$0xff] (%p797_p1)  ;;  %s1987_s30 = scalar_lea.hbm (%p797_p1), %s2474_s14, 2  ;;  %p1988_p7 = scmp.lt.s32.totalorder (%p797_p1), %s1982_s28, %s2474_s14 }
 0x15e   : >> { %1156 = vmatpush.bf16.msra.mxu2 %v1740_v37  ;;  %v1240_v45 = vld [vmem:[%s2468_s8 + $0x78] sm:$0xff] (%p797_p1)  ;;  %v1237_v20 = vld [vmem:[%s2468_s8 + $0x60] sm:$0xff] (%p797_p1)  ;;  %vm1218_vm8 = vcmp.eq.f32.partialorder (%p797_p1), %v1217_v55, 8.507059e+37 }
 0x15f   : >> { %1169 = vmatpush.bf16.msra.mxu3 %v1748_v38  ;;  %v825_v8 = vsel %vm2345_vm5, %v820_v0, %v824_v58  ;;  %v844_v9 = vrot.slane %v843_v6, 4  ;;  %v1233_v52 = vld [vmem:[%s2468_s8 + $0x40] sm:$0xff] (%p797_p1)  ;;  %v1232_v56 = vld [vmem:[%s2468_s8 + $0x38] sm:$0xff] (%p797_p1)  ;;  %v1231_v58 = vld [vmem:[%s2468_s8 + $0x30] sm:$0xff] (%p797_p1) }
 0x160   : >> { %1131 = vmatpush.bf16.msra.mxu0 %v1723_v48  ;;  %827 = vst [vmem:[#allocation3 + $0x4] sm:$0xf] %v825_v8  ;;  %v1235_v48 = vld [vmem:[%s2468_s8 + $0x50] sm:$0xff] (%p797_p1)  ;;  %v1860_v50 = vpop.eup (%p797_p1), %1859  ;;  %v1226_v6 = vld [vmem:[%s2468_s8 + $0x8] sm:$0xff] (%p797_p1) }
 0x161   : >> { %1144 = vmatpush.bf16.msra.mxu1 %v1731_v49  ;;  %v849_v14 = vsel %vm2345_vm5, %v844_v9, %v848_v7  ;;  %v1234_v49 = vld [vmem:[%s2468_s8 + $0x48] sm:$0xff] (%p797_p1)  ;;  %v1209_v51 = vmul.f32 (%p797_p1), %v1860_v50, %v1207_v47  ;;  %vm1214_vm6 = vweird.f32 (%p797_p1), %v1860_v50  ;;  %v1225_v7 = vld [vmem:[%s2468_s8] sm:$0xff] (%p797_p1)  ;;  %v1280_v8 = vld [vmem:[#allocation9 + $0x78] sm:$0xff] (%p797_p1) }
 0x162   : >> { %1157 = vmatpush.bf16.msra.mxu2 %v1739_v53  ;;  %851 = vst [vmem:[#allocation3 + $0xc] sm:$0xf] %v849_v14  ;;  %v1219_v53 = vand.u32 (%p797_p1), 2147483648, %v1207_v47  ;;  %v1279_v9 = vld [vmem:[#allocation9 + $0x70] sm:$0xff] (%p797_p1)  ;;  %v1274_v14 = vld [vmem:[#allocation9 + $0x48] sm:$0xff] (%p797_p1) }
 0x163   : >> { %1170 = vmatpush.bf16.msra.mxu3 %v1747_v54  ;;  %v1210_v54 = vsub.f32 (%p797_p1), 1.0, %v1209_v51 }
 0x164   : >> { %1132 = vmatpush.bf16.msra.mxu0 %v1722_v62  ;;  %v1220_v59 = vor.u32 (%p797_p1), 1.1754944e-38, %v1219_v53 }
 0x165   : >> { %1145 = vmatpush.bf16.msra.mxu1 %v1730_v63  ;;  %v1211_v57 = vmul.f32 (%p797_p1), %v1860_v50, %v1210_v54  ;;  %v1229_v63 = vld [vmem:[%s2468_s8 + $0x20] sm:$0xff] (%p797_p1) }
 0x166   : >> { %1158 = vmatpush.bf16.msra.mxu2 %v1738_v1  ;;  %v1228_v1 = vld [vmem:[%s2468_s8 + $0x18] sm:$0xff] (%p797_p1) }
 0x167   : >> { %1171 = vmatpush.bf16.msra.mxu3 %v1746_v5  ;;  %v852_v19 = vld [vmem:[#allocation3] sm:$0xff]  ;;  %v1212_v60 = vadd.f32 (%p797_p1), %v1860_v50, %v1211_v57  ;;  %v1227_v5 = vld [vmem:[%s2468_s8 + $0x10] sm:$0xff] (%p797_p1) }
 0x168   : >> { %1133 = vmatpush.bf16.msra.mxu0 %v1721_v10  ;;  %v923_v21 = vunpack.c.l.b16 %v852_v19  ;;  %v924_v22 = vunpack.c.h.b16 %v852_v19  ;;  %v1278_v10 = vld [vmem:[#allocation9 + $0x68] sm:$0xff] (%p797_p1)  ;;  %v1269_v19 = vld [vmem:[#allocation9 + $0x20] sm:$0xff] (%p797_p1) }
 0x169   : >> { %1146 = vmatpush.bf16.msra.mxu1 %v1729_v11  ;;  %v853_v3 = vld [vmem:[#allocation3 + $0x8] sm:$0xff]  ;;  %v1277_v11 = vld [vmem:[#allocation9 + $0x60] sm:$0xff] (%p797_p1) }
 0x16a   : >> { %1159 = vmatpush.bf16.msra.mxu2 %v1737_v12  ;;  %v927_v23 = vpack.c.b16 %v923_v21, %v923_v21  ;;  %v928_v2 = vpack.c.b16 %v924_v22, %v924_v22  ;;  %v925_v4 = vunpack.c.l.b16 %v853_v3  ;;  %v926_v26 = vunpack.c.h.b16 %v853_v3  ;;  %v1276_v12 = vld [vmem:[#allocation9 + $0x58] sm:$0xff] (%p797_p1)  ;;  %v1266_v3 = vld [vmem:[#allocation9 + $0x8] sm:$0xff] (%p797_p1) }
 0x16b   : >> { %1172 = vmatpush.bf16.msra.mxu3 %v1745_v13  ;;  %v1275_v13 = vld [vmem:[#allocation9 + $0x50] sm:$0xff] (%p797_p1)  ;;  %v1268_v21 = vld [vmem:[#allocation9 + $0x18] sm:$0xff] (%p797_p1) }
 0x16c   : >> { %1134 = vmatpush.bf16.msra.mxu0 %v1720_v15  ;;  %v929_v27 = vpack.c.b16 %v925_v4, %v925_v4  ;;  %v930_v28 = vpack.c.b16 %v926_v26, %v926_v26  ;;  %v1273_v15 = vld [vmem:[#allocation9 + $0x40] sm:$0xff] (%p797_p1)  ;;  %v1320_v26 = vld [vmem:[#allocation11 + $0x78] sm:$0xff] (%p797_p1) }
 0x16d   : >> { %1147 = vmatpush.bf16.msra.mxu1 %v1728_v16  ;;  %v1272_v16 = vld [vmem:[#allocation9 + $0x38] sm:$0xff] (%p797_p1)  ;;  %v1265_v4 = vld [vmem:[#allocation9] sm:$0xff] (%p797_p1) }
 0x16e   : >> { %1160 = vmatpush.bf16.msra.mxu2 %v1736_v17  ;;  %v1271_v17 = vld [vmem:[#allocation9 + $0x30] sm:$0xff] (%p797_p1) }
 0x16f   : >> { %1173 = vmatpush.bf16.msra.mxu3 %v1744_v18  ;;  %1135 = vmatmul.bf16.vlgmr.msra.gmra.mxu0 %v927_v23  ;;  %v1270_v18 = vld [vmem:[#allocation9 + $0x28] sm:$0xff] (%p797_p1) }
 0x170   : >> { %1148 = vmatmul.bf16.vlgmr.msra.gmra.mxu1 %v928_v2  ;;  %v1267_v2 = vld [vmem:[#allocation9 + $0x10] sm:$0xff] (%p797_p1) }
 0x171   : >> { %1161 = vmatmul.bf16.vlgmr.msra.gmra.mxu2 %v929_v27  ;;  %1282 = vmatpush.msra.mxu1 (%p797_p1), %v1280_v8  ;;  %v1319_v27 = vld [vmem:[#allocation11 + $0x70] sm:$0xff] (%p797_p1) }
 0x172   : >> { %1174 = vmatmul.bf16.vlgmr.msra.gmra.mxu3 %v930_v28  ;;  %1322 = vmatpush.msra.mxu2 (%p797_p1), %v1320_v26  ;;  %v1318_v28 = vld [vmem:[#allocation11 + $0x68] sm:$0xff] (%p797_p1) }
 0x173   : > { %1283 = vmatpush.msra.mxu1 (%p797_p1), %v1279_v9 }
 0x174   : > { %1323 = vmatpush.msra.mxu2 (%p797_p1), %v1319_v27 }
 0x175   : > { %1284 = vmatpush.msra.mxu1 (%p797_p1), %v1278_v10 }
 0x176   : > { %1324 = vmatpush.msra.mxu2 (%p797_p1), %v1318_v28 }
 0x177   : > { %1285 = vmatpush.msra.mxu1 (%p797_p1), %v1277_v11 }
 0x179   : > { %1286 = vmatpush.msra.mxu1 (%p797_p1), %v1276_v12 }
 0x17b   : > { %1287 = vmatpush.msra.mxu1 (%p797_p1), %v1275_v13 }
 0x17d   : > { %1288 = vmatpush.msra.mxu1 (%p797_p1), %v1274_v14 }
 0x17f   : > { %1289 = vmatpush.msra.mxu1 (%p797_p1), %v1273_v15 }
 0x181   : > { %1290 = vmatpush.msra.mxu1 (%p797_p1), %v1272_v16 }
 0x183   : > { %1291 = vmatpush.msra.mxu1 (%p797_p1), %v1271_v17 }
 0x185   : > { %1292 = vmatpush.msra.mxu1 (%p797_p1), %v1270_v18 }
 0x187   : > { %1293 = vmatpush.msra.mxu1 (%p797_p1), %v1269_v19 }
 0x189   : > { %1294 = vmatpush.msra.mxu1 (%p797_p1), %v1268_v21 }
 0x18b   : > { %1295 = vmatpush.msra.mxu1 (%p797_p1), %v1267_v2 }
 0x18d   : > { %1296 = vmatpush.msra.mxu1 (%p797_p1), %v1266_v3 }
 0x18f   : > { %1297 = vmatpush.msra.mxu1 (%p797_p1), %v1265_v4 }
 0x1ec   : >> { %v1136_v30 = vpop.f32.mrf.mxu0 }
 0x1ed   : >> { %v1149_v31 = vpop.f32.mrf.mxu1  ;;  %v1137_v32 = vadd.f32 %v1136_v30, %v919_v29  ;;  %v1317_v29 = vld [vmem:[#allocation11 + $0x60] sm:$0xff] (%p797_p1)  ;;  %v1316_v30 = vld [vmem:[#allocation11 + $0x58] sm:$0xff] (%p797_p1) }
 0x1ee   : > { %1325 = vmatpush.msra.mxu2 (%p797_p1), %v1317_v29 }
 0x1ef   : >> { %v1150_v33 = vadd.f32 %v1149_v31, %v1137_v32  ;;  %v1315_v31 = vld [vmem:[#allocation11 + $0x50] sm:$0xff] (%p797_p1)  ;;  %v1314_v32 = vld [vmem:[#allocation11 + $0x48] sm:$0xff] (%p797_p1) }
 0x1f0   : > { %1326 = vmatpush.msra.mxu2 (%p797_p1), %v1316_v30 }
 0x1f2   : > { %1327 = vmatpush.msra.mxu2 (%p797_p1), %v1315_v31 }
 0x1f4   : >> { %v1138_v34 = vpop.f32.mrf.mxu0  ;;  %v1162_v36 = vpop.f32.mrf.mxu2  ;;  %1328 = vmatpush.msra.mxu2 (%p797_p1), %v1314_v32 }
 0x1f5   : >> { %v1151_v35 = vpop.f32.mrf.mxu1  ;;  %v1175_v37 = vpop.f32.mrf.mxu3  ;;  %v1163_v38 = vadd.f32 %v1162_v36, %v1150_v33  ;;  %v1313_v33 = vld [vmem:[#allocation11 + $0x40] sm:$0xff] (%p797_p1)  ;;  %v1312_v34 = vld [vmem:[#allocation11 + $0x38] sm:$0xff] (%p797_p1)  ;;  %v1310_v36 = vld [vmem:[#allocation11 + $0x28] sm:$0xff] (%p797_p1) }
 0x1f6   : > { %1329 = vmatpush.msra.mxu2 (%p797_p1), %v1313_v33  ;;  %v1311_v35 = vld [vmem:[#allocation11 + $0x30] sm:$0xff] (%p797_p1) }
 0x1f7   : >> { %v1176_v39 = vadd.f32 %v1175_v37, %v1163_v38  ;;  %v1309_v37 = vld [vmem:[#allocation11 + $0x20] sm:$0xff] (%p797_p1)  ;;  %v1308_v38 = vld [vmem:[#allocation11 + $0x18] sm:$0xff] (%p797_p1) }
 0x1f8   : > { %1330 = vmatpush.msra.mxu2 (%p797_p1), %v1312_v34 }
 0x1f9   : >> { %v1179_v40 = vmax.f32 %v1176_v39, 0.0  ;;  %v1241_v39 = vld [vmem:[%s2469_s9] sm:$0x1] (%p797_p1) }
 0x1fa   : > { %1331 = vmatpush.msra.mxu2 (%p797_p1), %v1311_v35 }
 0x1fb   : >> { %1199 = vmatpush.msrb.mxu0 %v1179_v40 }
 0x1fc   : >> { %v1164_v41 = vpop.f32.mrf.mxu2  ;;  %1709 = vmatmul.msk.f32.vlgmr.msrb.gmra.mxu0 %vm558_vm4, %v2330_v24  ;;  %v1236_v24 = vld [vmem:[%s2468_s8 + $0x58] sm:$0xff] (%p797_p1)  ;;  %vm1213_vm4 = vweird.f32 (%p797_p1), %v1207_v47  ;;  %1332 = vmatpush.msra.mxu2 (%p797_p1), %v1310_v36 }
 0x1fd   : >> { %v1177_v42 = vpop.f32.mrf.mxu3  ;;  %1242 = vmatpush.msra.mxu0 (%p797_p1), %v1240_v45  ;;  %vm1215_vm7 = vmor (%p797_p1), %vm1213_vm4, %vm1214_vm6  ;;  %v1306_v45 = vld [vmem:[#allocation11 + $0x8] sm:$0xff] (%p797_p1) }
 0x1fe   : > { %v1216_v62 = vsel (%p797_p1), %vm1215_vm7, %v1860_v50, %v1212_v60  ;;  %1333 = vmatpush.msra.mxu2 (%p797_p1), %v1309_v37 }
 0x1ff   : > { %1243 = vmatpush.msra.mxu0 (%p797_p1), %v1239_v46  ;;  %v1221_v0 = vsel (%p797_p1), %vm1218_vm8, %v1220_v59, %v1216_v62  ;;  %v1305_v46 = vld [vmem:[#allocation11] sm:$0xff] (%p797_p1) }
 0x200   : > { %1753 = vpush (%p797_p1), %v1221_v0  ;;  %1334 = vmatpush.msra.mxu2 (%p797_p1), %v1308_v38 }
 0x231   : > { %s1754_s21 = spop (%p797_p1), %1753 }
 0x232   : > { %v1223_v22 = vstv (%p797_p1), %s1754_s21  ;;  %s1983_s21 = scalar_lea.hbm (%p797_p1), %s1982_s28, 1 }
 0x233   : > { %p1984_p2 = scmp.ne.s32.totalorder (%p797_p1), %s1982_s28, %s1983_s21  ;;  %p1989_p8 = scmp.lt.s32.totalorder (%p797_p1), %s1987_s30, %s1983_s21 }
 0x235   : > { %p1985_p3 = pnand (%p797_p1), %p1984_p2, %p2194_p5  ;;  %p1990_p9 = por (%p797_p1), %p1989_p8, %p1988_p7 }
 0x237   : > { %p1986_p4 = pneg (%p797_p1), %p1985_p3 }
 0x239   : > { %p1991_p10 = pnand (%p797_p1), %p1990_p9, %p1986_p4 }
 0x279   : >> { %v1201_v43 = vpop.f32.mrf.mxu0  ;;  %799 = sbr.rel (!%p797_p1) target bundleno = 335 (0x14f), region = 158 }
 0x27a   : >> { %v2357_v25 = vadd.f32 %v2059_v25, %v1201_v43  }
 0x27c   : >> { %v2499_v44 = vmov %v2357_v25 }
 0x27d   : >> { %v2500_v25 = vmov %v2499_v44  ;;  %v1224_v23 = vmul.f32 (%p797_p1), %v1223_v22, %v2499_v44  ;;  %v1307_v44 = vld [vmem:[#allocation11 + $0x10] sm:$0xff] (%p797_p1) }
 0x27e   : > { %v1238_v25 = vld [vmem:[%s2468_s8 + $0x68] sm:$0xff]  ;;  %1335 = vmatpush.msra.mxu2 %v1307_v44 }
 0x27f   : > { %1244 = vmatpush.msra.mxu0 %v1238_v25  ;;  %v1281_v25 = vld [vmem:[%s2471_s11] sm:$0x1] }
 0x280   : > { %1336 = vmatpush.msra.mxu2 %v1306_v45 }
 0x281   : > { %1245 = vmatpush.msra.mxu0 %v1237_v20 }
 0x282   : > { %1337 = vmatpush.msra.mxu2 %v1305_v46 }
 0x283   : > { %1246 = vmatpush.msra.mxu0 %v1236_v24 }
 0x285   : > { %1247 = vmatpush.msra.mxu0 %v1235_v48 }
 0x287   : > { %1248 = vmatpush.msra.mxu0 %v1234_v49  ;;  %v1321_v49 = vld [vmem:[%s2473_s13] sm:$0x1] }
 0x289   : > { %1249 = vmatpush.msra.mxu0 %v1233_v52 }
 0x28b   : > { %1250 = vmatpush.msra.mxu0 %v1232_v56 }
 0x28d   : > { %1251 = vmatpush.msra.mxu0 %v1231_v58 }
 0x28f   : > { %1252 = vmatpush.msra.mxu0 %v1230_v61 }
 0x291   : > { %1253 = vmatpush.msra.mxu0 %v1229_v63 }
 0x293   : > { %1254 = vmatpush.msra.mxu0 %v1228_v1 }
 0x295   : > { %1255 = vmatpush.msra.mxu0 %v1227_v5 }
 0x297   : > { %1256 = vmatpush.msra.mxu0 %v1226_v6 }
 0x299   : > { %1257 = vmatpush.msra.mxu0 %v1225_v7 }
 0x29a   : > { %1258 = vmatmul.f32.vlgmr.msra.gmra.mxu0 %v1224_v23 }
 0x317   : > { %v1259_v40 = vpop.f32.mrf.mxu0 }
 0x318   : > { %v1260_v41 = vadd.f32 %v1259_v40, %v1241_v39 }
 0x31a   : > { %vm1262_vm9 = vcmp.gt.f32.partialorder %v1260_v41, 0.0  ;;  %v1263_v42 = vmul.f32 0.01, %v1260_v41 }
 0x31c   : > { %v1264_v43 = vsel %vm1262_vm9, %v1260_v41, %v1263_v42 }
 0x31d   : > { %1298 = vmatmul.f32.vlgmr.msra.gmra.mxu1 %v1264_v43 }
 0x39a   : > { %v1299_v47 = vpop.f32.mrf.mxu1 }
 0x39b   : > { %v1300_v20 = vadd.f32 %v1299_v47, %v1281_v25 }
 0x39d   : > { %vm1302_vm10 = vcmp.gt.f32.partialorder %v1300_v20, 0.0  ;;  %v1303_v24 = vmul.f32 0.01, %v1300_v20 }
 0x39f   : > { %v1304_v48 = vsel %vm1302_vm10, %v1300_v20, %v1303_v24 }
 0x3a0   : > { %1338 = vmatmul.f32.vlgmr.msra.gmra.mxu2 %v1304_v48 }
 0x423   : > { %v1339_v50 = vpop.f32.mrf.mxu2 }
 0x424   : > { %v1340_v51 = vadd.f32 %v1339_v50, %v1321_v49 }
 0x426   : > { %v1342_v52 = vmul.f32 %v1340_v51, %v1340_v51 }
 0x428   : > { %v1344_v53 = vsel %vm519_vm0, %v1342_v52, 0.0 }
 0x429   : > { %1345 = vadd.xlane.f32.xlu0 %v1344_v53 }
 0x49c   : > { %v1346_v54 = vpop.xlane.xlu0 %1345 }
 0x49d   : > { %1861 = vrsqrt.f32 %v1346_v54  ;;  %vm1354_vm11 = vcmp.eq.f32.partialorder %v1346_v54, inf  ;;  %v1357_v62 = vand.u32 2147483648, %v1346_v54  ;;  %vm1356_vm12 = vcmp.eq.f32.partialorder %v1346_v54, 0.0 }
 0x4a3   : > { %v1862_v55 = vpop.eup %1861 }
 0x4a4   : > { %v1348_v56 = vmul.f32 %v1862_v55, %v1346_v54 }
 0x4a6   : > { %v1349_v57 = vmul.f32 %v1862_v55, %v1348_v56 }
 0x4a8   : > { %v1350_v58 = vmul.f32 0.5, %v1349_v57 }
 0x4aa   : > { %v1351_v59 = vsub.f32 1.5, %v1350_v58 }
 0x4ac   : > { %v1352_v60 = vmul.f32 %v1862_v55, %v1351_v59 }
 0x4ae   : > { %v1353_v61 = vmul.f32 %v1352_v60, %v1346_v54 }
 0x4b0   : > { %v1355_v63 = vsel %vm1354_vm11, %v1346_v54, %v1353_v61 }
 0x4b1   : > { %v1358_v0 = vsel %vm1356_vm12, %v1357_v62, %v1355_v63 }
 0x4b2   : > { %v1359_v1 = vmax.f32 %v1358_v0, 1e-12 }
 0x4b4   : > { %1863 = vrcp.f32 %v1359_v1  ;;  %v1371_v8 = vand.u32 2147483648, %v1359_v1  ;;  %v1369_v10 = vand.u32 2147483647, %v1359_v1  ;;  %vm1365_vm13 = vweird.f32 %v1359_v1 }
 0x4b6   : > { %v1372_v12 = vor.u32 1.1754944e-38, %v1371_v8  ;;  %vm1370_vm15 = vcmp.eq.f32.partialorder %v1369_v10, 8.507059e+37 }
 0x4ba   : > { %v1864_v5 = vpop.eup %1863 }
 0x4bb   : > { %v1361_v6 = vmul.f32 %v1864_v5, %v1359_v1  ;;  %vm1366_vm0 = vweird.f32 %v1864_v5 }
 0x4bc   : > { %vm1367_vm14 = vmor %vm1365_vm13, %vm1366_vm0 }
 0x4bd   : > { %v1362_v7 = vsub.f32 1.0, %v1361_v6 }
 0x4bf   : > { %v1363_v9 = vmul.f32 %v1864_v5, %v1362_v7 }
 0x4c1   : > { %v1364_v11 = vadd.f32 %v1864_v5, %v1363_v9 }
 0x4c3   : > { %v1368_v13 = vsel %vm1367_vm14, %v1864_v5, %v1364_v11 }
 0x4c4   : > { %v1373_v14 = vsel %vm1370_vm15, %v1372_v12, %v1368_v13 }
 0x4c5   : > { %v1374_v15 = vmul.f32 %v1373_v14, %v1340_v51 }
 0x4c7   : > { %1375 = vst [vmem:[%s2288_s24] sm:$0x1] %v1374_v15 }
 0x4c8   : > { %1994 = shalt.err (!%p1991_p10)
}
 0x4c9   : > { %1767 = dma.vmem_to_hbm [thread:$0]  (%p2194_p5), %s1388_s19, 16, %s1390_s20, %s1377_s27  }
 0x4ca PF: > { %s2501_s10 = sld [smem:[#allocation19_spill]] }
 0x4cb   : > { %s2502_s24 = sld [smem:[#allocation17_spill]] }
 0x4d0   : > { %p1789_p11 = scmp.ge.s32.totalorder %s2501_s10, 2 }
 0x4d1   : > { %s1401_s22 = sand.u32 1, %s2502_s24  }
 0x4d2   : > { %p1780_p12 = pnand %p1789_p11, %p2198_p6  ;;  %s1402_s15 = scalar_lea.sflag [#allocation8], %s1401_s22 }
 0x4d4   : > { %p1781_p13 = pneg %p1780_p12 }
 0x4d6   : > { %2034 = dma.done.wait (%p1781_p13), %s1402_s15, 16  }
 0x4d7   : > { %2036 = vsyncadd (%p1781_p13), %s1402_s15, 4294967280  ;;  %s2504_s20 = sld [smem:[#allocation20_spill]]  ;;  %s2507_s17 = smov %s2043_s18 }
 0x4d8   : > { %s2505_s6 = sld [smem:[#allocation18_spill]] }
 0x4d9   : > { %s2506_s19 = sld [smem:[#allocation21_spill]] }
 0x4dd   : > { %p34_p0 = scmp.ge.s32.totalorder %s2504_s20, 4  }
 0x4de   : > { %s2508_s18 = smov %s2505_s6 }
 0x4df   :  { %36 = sbr.rel (!%p34_p0) target bundleno = 12 (0xc), region = 169 }
 0x4e4   :  { %1407 = vsyncpa [#allocation7], 1 }
 0x4e5   :  { %1409 = vsyncpa [#allocation7 + $0x1], 1 }
 0x4e6   :  { %1410 = vsyncpa [#allocation10], 1 }
 0x4e7   :  { %1411 = vsyncpa [#allocation8], 1 }
 0x4e8   :  { %1413 = vsyncpa [#allocation8 + $0x1], 1 }

</bundles_post_ra>
